<compile_context>
chip_gen: v5e
topology: v5e:2x2
jax: 0.10.0
libtpu: 0.0.40
codegen_flags: <defaults>
</compile_context>

<pallas_src>
import jax
import jax.numpy as jnp
from jax.experimental import pallas as pl
from jax.experimental.pallas import tpu as pltpu

THETA = 0.7          # CD_Conv2d theta (CDCN default)
BN_EPS = 1e-5


def _round_up(v, m):
    return ((v + m - 1) // m) * m


# ----------------------------------------------------------------------------
# Pallas kernel: one grid step == one batch element, full bottleneck fused.
# ----------------------------------------------------------------------------
def _bottleneck_kernel(x_ref, w1_ref, s1_ref, b1_ref,
                       w2_ref, s2_ref, b2_ref,
                       w3_ref, s3_ref, b3_ref,
                       out_ref, h1p_ref):
    H, W, Cin = x_ref.shape[1], x_ref.shape[2], x_ref.shape[3]
    Cw = w1_ref.shape[1]
    HW = H * W
    Wp = h1p_ref.shape[1]            # sublane-aligned padded width (>= W + 2)

    # ---- conv1 (1x1) + bn1 + relu: bf16 MXU operands, f32 accumulation ------
    xb = x_ref[0].reshape(HW, Cin).astype(jnp.bfloat16)       # dies after dot
    h1 = jnp.dot(xb, w1_ref[...], preferred_element_type=jnp.float32)
    h1 = jnp.maximum(h1 * s1_ref[...] + b1_ref[...], 0.0)     # (HW, Cw) f32

    # ---- stage h1 (bf16) into the persistent padded VMEM scratch ------------
    # Only the halo is zeroed each step (cheap); we cannot rely on scratch
    # state from a previous grid step because the batch axis is "parallel"
    # (megacore may run steps on different cores with distinct scratch).
    zrow = jnp.zeros((Wp, Cw), jnp.bfloat16)
    h1p_ref[0, :, :] = zrow                                    # top halo row
    h1p_ref[H + 1, :, :] = zrow                                # bottom halo row
    zcol = jnp.zeros((H, 1, Cw), jnp.bfloat16)
    h1p_ref[1:H + 1, 0:1, :] = zcol                            # left halo col
    h1p_ref[1:H + 1, W + 1:W + 2, :] = zcol                    # right halo col
    h1p_ref[1:H + 1, 1:W + 1, :] = h1.reshape(H, W, Cw).astype(jnp.bfloat16)

    # ---- conv2: 3x3 central-difference conv (center tap pre-folded) ---------
    # Grouped as 3 matmuls with K = 3*Cw: for each ky, the operand is the
    # 3-wide shifted window concatenated along channels.
    def win(ky):
        return jnp.concatenate(
            [h1p_ref[ky:ky + H, 0:W, :],
             h1p_ref[ky:ky + H, 1:W + 1, :],
             h1p_ref[ky:ky + H, 2:W + 2, :]], axis=-1).reshape(HW, 3 * Cw)

    acc = jnp.dot(win(0), w2_ref[0], preferred_element_type=jnp.float32)
    acc = acc + jnp.dot(win(1), w2_ref[1], preferred_element_type=jnp.float32)
    acc = acc + jnp.dot(win(2), w2_ref[2], preferred_element_type=jnp.float32)
    h2 = jnp.maximum(acc * s2_ref[...] + b2_ref[...], 0.0)     # (HW, Cw) f32
    h2 = h2.astype(jnp.bfloat16)

    # ---- conv3 (1x1) + bn3 + residual + relu ---------------------------------
    h3 = jnp.dot(h2, w3_ref[...], preferred_element_type=jnp.float32)
    # Re-read the input tile for the residual instead of keeping a reshaped
    # f32 copy live through the whole kernel.
    res = x_ref[0].reshape(HW, Cin).astype(jnp.float32)
    out = jnp.maximum(h3 * s3_ref[...] + b3_ref[...] + res, 0.0)
    out_ref[0] = out.reshape(H, W, -1).astype(out_ref.dtype)


def bottleneck_pallas(x_nhwc, w1, s1, b1, w2g, s2, b2, w3, s3, b3):
    """NHWC-in / NHWC-out fused Bottleneck. Use this when chaining blocks."""
    N, H, W, Cin = x_nhwc.shape
    width = w1.shape[1]
    Cout = w3.shape[1]
    assert Cin == Cout, "stride=1 / no-downsample Bottleneck needs Cin == Cout"
    Wp = _round_up(W + 2, 8)   # sublane-align the padded width

    return pl.pallas_call(
        _bottleneck_kernel,
        out_shape=jax.ShapeDtypeStruct((N, H, W, Cout), x_nhwc.dtype),
        grid_spec=pltpu.PrefetchScalarGridSpec(
            num_scalar_prefetch=0,
            grid=(N,),
            in_specs=[
                pl.BlockSpec((1, H, W, Cin), lambda n: (n, 0, 0, 0)),
                pl.BlockSpec((Cin, width), lambda n: (0, 0)),
                pl.BlockSpec((1, width), lambda n: (0, 0)),
                pl.BlockSpec((1, width), lambda n: (0, 0)),
                pl.BlockSpec((3, 3 * width, width), lambda n: (0, 0, 0)),
                pl.BlockSpec((1, width), lambda n: (0, 0)),
                pl.BlockSpec((1, width), lambda n: (0, 0)),
                pl.BlockSpec((width, Cout), lambda n: (0, 0)),
                pl.BlockSpec((1, Cout), lambda n: (0, 0)),
                pl.BlockSpec((1, Cout), lambda n: (0, 0)),
            ],
            out_specs=pl.BlockSpec((1, H, W, Cout), lambda n: (n, 0, 0, 0)),
            scratch_shapes=[pltpu.VMEM((H + 2, Wp, width), jnp.bfloat16)],
        ),
        compiler_params=pltpu.CompilerParams(
            # Each batch element writes a disjoint output block -> safe to run
            # in parallel; shards the N axis across both TCs on v7x.
            dimension_semantics=("parallel",),
            vmem_limit_bytes=48 * 1024 * 1024,
        ),
    )(x_nhwc, w1, s1, b1, w2g, s2, b2, w3, s3, b3)


# ----------------------------------------------------------------------------
# Parameter construction (deterministic, PyTorch weight conventions OIHW)
# ----------------------------------------------------------------------------
def make_params(key, inplanes, planes, base_width=64, groups=1):
    width = int(planes * (base_width / 64.0)) * groups
    cout = planes * 4  # expansion
    ks = jax.random.split(key, 16)

    def normal(k, shape, scale=0.1):
        return scale * jax.random.normal(k, shape, dtype=jnp.float32)

    def bn_params(k, c):
        k1, k2, k3, k4 = jax.random.split(k, 4)
        gamma = jax.random.uniform(k1, (c,), minval=0.5, maxval=1.5)
        beta = 0.1 * jax.random.normal(k2, (c,))
        mean = 0.1 * jax.random.normal(k3, (c,))
        var = jax.random.uniform(k4, (c,), minval=0.5, maxval=1.5)
        return (gamma.astype(jnp.float32), beta.astype(jnp.float32),
                mean.astype(jnp.float32), var.astype(jnp.float32))

    p = {
        "w1": normal(ks[0], (width, inplanes, 1, 1)),   # conv1x1
        "bn1": bn_params(ks[1], width),
        "w2": normal(ks[2], (width, width, 3, 3)),      # CD_Conv2d 3x3
        "bn2": bn_params(ks[3], width),
        "w3": normal(ks[4], (cout, width, 1, 1)),       # conv1x1
        "bn3": bn_params(ks[5], cout),
    }
    return p, width, cout


def fold_bn(gamma, beta, mean, var):
    scale = gamma / jnp.sqrt(var + BN_EPS)
    bias = beta - mean * scale
    return scale, bias


def _fold_cd_center(w2):
    """Fold the CD term into the 3x3 kernel's center tap (f32)."""
    wsum = w2.sum(axis=(2, 3))                        # (O, I)
    return w2.at[:, :, 1, 1].add(-THETA * wsum)


def pack_for_kernel(p):
    """Rearrange PyTorch-layout params into kernel (matmul) layout.

    Weights are cast to bf16 (MXU operands); BN scale/bias stay f32.
    """
    w1 = jnp.transpose(p["w1"][:, :, 0, 0], (1, 0)).astype(jnp.bfloat16)  # (Cin, width)
    w3 = jnp.transpose(p["w3"][:, :, 0, 0], (1, 0)).astype(jnp.bfloat16)  # (width, Cout)

    w2eff = _fold_cd_center(p["w2"])                  # (O, I, 3, 3), f32 fold
    O, I = w2eff.shape[0], w2eff.shape[1]
    # Group taps along K: (O, I, ky, kx) -> (ky, kx*I + i, O) so the kernel's
    # 3-wide channel-concatenated window multiplies a single (3*I, O) matrix.
    w2g = jnp.transpose(w2eff, (2, 3, 1, 0)).reshape(3, 3 * I, O)
    w2g = w2g.astype(jnp.bfloat16)

    s1, b1 = fold_bn(*p["bn1"])
    s2, b2 = fold_bn(*p["bn2"])
    s3, b3 = fold_bn(*p["bn3"])
    row = lambda v: v.reshape(1, -1).astype(jnp.float32)
    return (w1, row(s1), row(b1), w2g, row(s2), row(b2),
            w3, row(s3), row(b3))


# ----------------------------------------------------------------------------
# References (NCHW).  ref_forward mirrors the PyTorch module in pure f32;
# ref_forward_mxu uses the same numerics as the kernel (CD fold + bf16 MXU
# operands with f32 accumulation) for a tight apples-to-apples check.
# ----------------------------------------------------------------------------
def _conv_nchw(x, w, padding=0, operand_dtype=None):
    if operand_dtype is not None:
        x = x.astype(operand_dtype)
        w = w.astype(operand_dtype)
    return jax.lax.conv_general_dilated(
        x, w, (1, 1), [(padding, padding), (padding, padding)],
        dimension_numbers=("NCHW", "OIHW", "NCHW"),
        preferred_element_type=jnp.float32)


def _bn_nchw(x, stats):
    s, b = fold_bn(*stats)
    return x * s[None, :, None, None] + b[None, :, None, None]


def ref_forward(x_nchw, p):
    """Pure-f32 reference mirroring the PyTorch Bottleneck forward."""
    out = jax.nn.relu(_bn_nchw(_conv_nchw(x_nchw, p["w1"]), p["bn1"]))
    wsum = p["w2"].sum(axis=(2, 3), keepdims=True)          # 1x1 diff kernel
    out = _conv_nchw(out, p["w2"], padding=1) - THETA * _conv_nchw(out, wsum)
    out = jax.nn.relu(_bn_nchw(out, p["bn2"]))
    out = _bn_nchw(_conv_nchw(out, p["w3"]), p["bn3"])
    return jax.nn.relu(out + x_nchw)


def ref_forward_mxu(x_nchw, p):
    """Kernel-precision reference: CD center tap folded in f32, conv operands
    cast to bf16, f32 accumulation, BN/residual in f32."""
    bf = jnp.bfloat16
    out = jax.nn.relu(_bn_nchw(_conv_nchw(x_nchw, p["w1"], operand_dtype=bf),
                               p["bn1"]))
    w2eff = _fold_cd_center(p["w2"])
    out = _conv_nchw(out, w2eff, padding=1, operand_dtype=bf)
    out = jax.nn.relu(_bn_nchw(out, p["bn2"]))
    out = _bn_nchw(_conv_nchw(out, p["w3"], operand_dtype=bf), p["bn3"])
    return jax.nn.relu(out + x_nchw)


# ----------------------------------------------------------------------------
def bottleneck_forward(x_nchw, p):
    """PyTorch-compatible entry point: NCHW in, NCHW out.

    NOTE: when stacking many blocks, keep activations NHWC end-to-end and call
    bottleneck_pallas directly; these boundary transposes are a full HBM
    round-trip of the activations per block.
    """
    x_nhwc = jnp.transpose(x_nchw, (0, 2, 3, 1))
    args = pack_for_kernel(p)
    y_nhwc = bottleneck_pallas(x_nhwc, *args)
    return jnp.transpose(y_nhwc, (0, 3, 1, 2))


if __name__ == "__main__":
    key = jax.random.PRNGKey(0)
    k_x, k_p = jax.random.split(key)

    # inplanes == planes * expansion (stride=1, no downsample); lane-dense
    # channel counts, tiny spatial to keep the demo fast.
    N, inplanes, planes, H, W = 2, 256, 64, 8, 8
    x = jax.random.normal(k_x, (N, inplanes, H, W), dtype=jnp.float32)

    params, width, cout = make_params(k_p, inplanes, planes)

    y = jax.block_until_ready(bottleneck_forward(x, params))

    y_mxu = jax.block_until_ready(ref_forward_mxu(x, params))
    y_f32 = jax.block_until_ready(ref_forward(x, params))

    assert y.shape == y_f32.shape == (N, cout, H, W)
    # Tight check against a reference with the kernel's MXU numerics
    # (bf16 operands, f32 accumulation, folded CD center tap).
    assert jnp.allclose(y, y_mxu, atol=2e-2, rtol=2e-2), (
        float(jnp.max(jnp.abs(y - y_mxu))))
    # Loose sanity check against the pure-f32 PyTorch-equivalent reference;
    # the gap is the expected bf16-operand drift for these magnitudes.
    assert jnp.allclose(y, y_f32, atol=2.5e-1, rtol=1e-1), (
        float(jnp.max(jnp.abs(y - y_f32))))

    print("KERNEL_OK")
</pallas_src>

<mosaic_0001>
module attributes {stable_mosaic.version = 11 : i64} {
  func.func @_bottleneck_kernel(%arg0: i32, %arg1: memref<1x8x8x256xf32, #tpu.memory_space<vmem>>, %arg2: memref<256x64xbf16, #tpu.memory_space<vmem>>, %arg3: memref<1x64xf32, #tpu.memory_space<vmem>>, %arg4: memref<1x64xf32, #tpu.memory_space<vmem>>, %arg5: memref<3x192x64xbf16, #tpu.memory_space<vmem>>, %arg6: memref<1x64xf32, #tpu.memory_space<vmem>>, %arg7: memref<1x64xf32, #tpu.memory_space<vmem>>, %arg8: memref<64x256xbf16, #tpu.memory_space<vmem>>, %arg9: memref<1x256xf32, #tpu.memory_space<vmem>>, %arg10: memref<1x256xf32, #tpu.memory_space<vmem>>, %arg11: memref<1x8x8x256xf32, #tpu.memory_space<vmem>>, %arg12: memref<10x16x64xbf16, #tpu.memory_space<vmem>>) attributes {dimension_semantics = [#tpu.dimension_semantics<parallel>], iteration_bounds = array<i64: 2>, scalar_prefetch = 0 : i64, scratch_operands = 1 : i64, tpu.core_type = #tpu.core_type<tc>, window_params = [{transform_indices = @transform_0, window_bounds = array<i64: 1, 8, 8, 256>}, {pipeline_mode = #tpu.pipeline_mode<synchronous>, transform_indices = @transform_1, window_bounds = array<i64: 256, 64>}, {pipeline_mode = #tpu.pipeline_mode<synchronous>, transform_indices = @transform_2, window_bounds = array<i64: 1, 64>}, {pipeline_mode = #tpu.pipeline_mode<synchronous>, transform_indices = @transform_3, window_bounds = array<i64: 1, 64>}, {pipeline_mode = #tpu.pipeline_mode<synchronous>, transform_indices = @transform_4, window_bounds = array<i64: 3, 192, 64>}, {pipeline_mode = #tpu.pipeline_mode<synchronous>, transform_indices = @transform_5, window_bounds = array<i64: 1, 64>}, {pipeline_mode = #tpu.pipeline_mode<synchronous>, transform_indices = @transform_6, window_bounds = array<i64: 1, 64>}, {pipeline_mode = #tpu.pipeline_mode<synchronous>, transform_indices = @transform_7, window_bounds = array<i64: 64, 256>}, {pipeline_mode = #tpu.pipeline_mode<synchronous>, transform_indices = @transform_8, window_bounds = array<i64: 1, 256>}, {pipeline_mode = #tpu.pipeline_mode<synchronous>, transform_indices = @transform_9, window_bounds = array<i64: 1, 256>}, {transform_indices = @transform_10, window_bounds = array<i64: 1, 8, 8, 256>}]} {
    %c0 = arith.constant 0 : index
    %c0_0 = arith.constant 0 : index
    %c0_1 = arith.constant 0 : index
    %c0_2 = arith.constant 0 : index
    %0 = vector.load %arg1[%c0, %c0_0, %c0_1, %c0_2] : memref<1x8x8x256xf32, #tpu.memory_space<vmem>>, vector<1x8x8x256xf32>
    %1 = vector.shape_cast %0 : vector<1x8x8x256xf32> to vector<8x8x256xf32>
    %2 = vector.shape_cast %1 : vector<8x8x256xf32> to vector<64x256xf32>
    %3 = arith.truncf %2 : vector<64x256xf32> to vector<64x256xbf16>
    %c0_3 = arith.constant 0 : index
    %c0_4 = arith.constant 0 : index
    %4 = vector.load %arg2[%c0_3, %c0_4] : memref<256x64xbf16, #tpu.memory_space<vmem>>, vector<256x64xbf16>
    %cst = arith.constant dense<0.000000e+00> : vector<64x64xf32>
    %5 = tpu.matmul %3, %4, %cst {dimension_numbers = #tpu.dot_dimension_numbers<[1], [0], [0], [1], [0, 0, 1, 1], [], []>} : vector<64x256xbf16>, vector<256x64xbf16>, vector<64x64xf32> -> vector<64x64xf32>
    %c0_5 = arith.constant 0 : index
    %c0_6 = arith.constant 0 : index
    %6 = vector.load %arg3[%c0_5, %c0_6] : memref<1x64xf32, #tpu.memory_space<vmem>>, vector<1x64xf32>
    %7 = vector.broadcast %6 : vector<1x64xf32> to vector<64x64xf32>
    %8 = arith.mulf %5, %7 : vector<64x64xf32>
    %c0_7 = arith.constant 0 : index
    %c0_8 = arith.constant 0 : index
    %9 = vector.load %arg4[%c0_7, %c0_8] : memref<1x64xf32, #tpu.memory_space<vmem>>, vector<1x64xf32>
    %10 = vector.broadcast %9 : vector<1x64xf32> to vector<64x64xf32>
    %11 = arith.addf %8, %10 : vector<64x64xf32>
    %cst_9 = arith.constant 0.000000e+00 : f32
    %12 = vector.broadcast %cst_9 : f32 to vector<64x64xf32>
    %13 = arith.maximumf %11, %12 : vector<64x64xf32>
    %cst_10 = arith.constant 0.000000e+00 : bf16
    %14 = vector.broadcast %cst_10 : bf16 to vector<16x64xbf16>
    %c0_11 = arith.constant 0 : index
    %c0_12 = arith.constant 0 : index
    %c0_13 = arith.constant 0 : index
    %15 = vector.load %arg12[%c0_11, %c0_12, %c0_13] : memref<10x16x64xbf16, #tpu.memory_space<vmem>>, vector<1x16x64xbf16>
    %16 = vector.shape_cast %15 : vector<1x16x64xbf16> to vector<16x64xbf16>
    %17 = vector.shape_cast %14 : vector<16x64xbf16> to vector<1x16x64xbf16>
    tpu.vector_store %arg12[%c0_11, %c0_12, %c0_13], %17 {strides = array<i32>} : memref<10x16x64xbf16, #tpu.memory_space<vmem>>, vector<1x16x64xbf16>,
    %c9 = arith.constant 9 : index
    %c0_14 = arith.constant 0 : index
    %c0_15 = arith.constant 0 : index
    %18 = vector.load %arg12[%c9, %c0_14, %c0_15] : memref<10x16x64xbf16, #tpu.memory_space<vmem>>, vector<1x16x64xbf16>
    %19 = vector.shape_cast %18 : vector<1x16x64xbf16> to vector<16x64xbf16>
    %20 = vector.shape_cast %14 : vector<16x64xbf16> to vector<1x16x64xbf16>
    tpu.vector_store %arg12[%c9, %c0_14, %c0_15], %20 {strides = array<i32>} : memref<10x16x64xbf16, #tpu.memory_space<vmem>>, vector<1x16x64xbf16>,
    %cst_16 = arith.constant 0.000000e+00 : bf16
    %21 = vector.broadcast %cst_16 : bf16 to vector<8x1x64xbf16>
    %c1 = arith.constant 1 : index
    %c0_17 = arith.constant 0 : index
    %c0_18 = arith.constant 0 : index
    %22 = vector.load %arg12[%c1, %c0_17, %c0_18] : memref<10x16x64xbf16, #tpu.memory_space<vmem>>, vector<8x1x64xbf16>
    tpu.vector_store %arg12[%c1, %c0_17, %c0_18], %21 {strides = array<i32>} : memref<10x16x64xbf16, #tpu.memory_space<vmem>>, vector<8x1x64xbf16>,
    %c1_19 = arith.constant 1 : index
    %c9_20 = arith.constant 9 : index
    %c0_21 = arith.constant 0 : index
    %23 = vector.load %arg12[%c1_19, %c9_20, %c0_21] : memref<10x16x64xbf16, #tpu.memory_space<vmem>>, vector<8x1x64xbf16>
    tpu.vector_store %arg12[%c1_19, %c9_20, %c0_21], %21 {strides = array<i32>} : memref<10x16x64xbf16, #tpu.memory_space<vmem>>, vector<8x1x64xbf16>,
    %24 = vector.shape_cast %13 : vector<64x64xf32> to vector<8x8x64xf32>
    %25 = arith.truncf %24 : vector<8x8x64xf32> to vector<8x8x64xbf16>
    %c1_22 = arith.constant 1 : index
    %c1_23 = arith.constant 1 : index
    %c0_24 = arith.constant 0 : index
    %26 = vector.load %arg12[%c1_22, %c1_23, %c0_24] : memref<10x16x64xbf16, #tpu.memory_space<vmem>>, vector<8x8x64xbf16>
    tpu.vector_store %arg12[%c1_22, %c1_23, %c0_24], %25 {strides = array<i32>} : memref<10x16x64xbf16, #tpu.memory_space<vmem>>, vector<8x8x64xbf16>,
    %c0_25 = arith.constant 0 : index
    %c0_26 = arith.constant 0 : index
    %c0_27 = arith.constant 0 : index
    %27 = vector.load %arg12[%c0_25, %c0_26, %c0_27] : memref<10x16x64xbf16, #tpu.memory_space<vmem>>, vector<8x8x64xbf16>
    %c0_28 = arith.constant 0 : index
    %c1_29 = arith.constant 1 : index
    %c0_30 = arith.constant 0 : index
    %28 = vector.load %arg12[%c0_28, %c1_29, %c0_30] : memref<10x16x64xbf16, #tpu.memory_space<vmem>>, vector<8x8x64xbf16>
    %c0_31 = arith.constant 0 : index
    %c2 = arith.constant 2 : index
    %c0_32 = arith.constant 0 : index
    %29 = vector.load %arg12[%c0_31, %c2, %c0_32] : memref<10x16x64xbf16, #tpu.memory_space<vmem>>, vector<8x8x64xbf16>
    %30 = tpu.concatenate %27, %28, %29 in 2 : vector<8x8x64xbf16>, vector<8x8x64xbf16>, vector<8x8x64xbf16> -> vector<8x8x192xbf16>
    %31 = vector.shape_cast %30 : vector<8x8x192xbf16> to vector<64x192xbf16>
    %c0_33 = arith.constant 0 : index
    %c0_34 = arith.constant 0 : index
    %c0_35 = arith.constant 0 : index
    %32 = vector.load %arg5[%c0_33, %c0_34, %c0_35] : memref<3x192x64xbf16, #tpu.memory_space<vmem>>, vector<1x192x64xbf16>
    %33 = vector.shape_cast %32 : vector<1x192x64xbf16> to vector<192x64xbf16>
    %cst_36 = arith.constant dense<0.000000e+00> : vector<64x64xf32>
    %34 = tpu.matmul %31, %33, %cst_36 {dimension_numbers = #tpu.dot_dimension_numbers<[1], [0], [0], [1], [0, 0, 1, 1], [], []>} : vector<64x192xbf16>, vector<192x64xbf16>, vector<64x64xf32> -> vector<64x64xf32>
    %c1_37 = arith.constant 1 : index
    %c0_38 = arith.constant 0 : index
    %c0_39 = arith.constant 0 : index
    %35 = vector.load %arg12[%c1_37, %c0_38, %c0_39] : memref<10x16x64xbf16, #tpu.memory_space<vmem>>, vector<8x8x64xbf16>
    %c1_40 = arith.constant 1 : index
    %c1_41 = arith.constant 1 : index
    %c0_42 = arith.constant 0 : index
    %36 = vector.load %arg12[%c1_40, %c1_41, %c0_42] : memref<10x16x64xbf16, #tpu.memory_space<vmem>>, vector<8x8x64xbf16>
    %c1_43 = arith.constant 1 : index
    %c2_44 = arith.constant 2 : index
    %c0_45 = arith.constant 0 : index
    %37 = vector.load %arg12[%c1_43, %c2_44, %c0_45] : memref<10x16x64xbf16, #tpu.memory_space<vmem>>, vector<8x8x64xbf16>
    %38 = tpu.concatenate %35, %36, %37 in 2 : vector<8x8x64xbf16>, vector<8x8x64xbf16>, vector<8x8x64xbf16> -> vector<8x8x192xbf16>
    %39 = vector.shape_cast %38 : vector<8x8x192xbf16> to vector<64x192xbf16>
    %c1_46 = arith.constant 1 : index
    %c0_47 = arith.constant 0 : index
    %c0_48 = arith.constant 0 : index
    %40 = vector.load %arg5[%c1_46, %c0_47, %c0_48] : memref<3x192x64xbf16, #tpu.memory_space<vmem>>, vector<1x192x64xbf16>
    %41 = vector.shape_cast %40 : vector<1x192x64xbf16> to vector<192x64xbf16>
    %cst_49 = arith.constant dense<0.000000e+00> : vector<64x64xf32>
    %42 = tpu.matmul %39, %41, %cst_49 {dimension_numbers = #tpu.dot_dimension_numbers<[1], [0], [0], [1], [0, 0, 1, 1], [], []>} : vector<64x192xbf16>, vector<192x64xbf16>, vector<64x64xf32> -> vector<64x64xf32>
    %43 = arith.addf %34, %42 : vector<64x64xf32>
    %c2_50 = arith.constant 2 : index
    %c0_51 = arith.constant 0 : index
    %c0_52 = arith.constant 0 : index
    %44 = vector.load %arg12[%c2_50, %c0_51, %c0_52] : memref<10x16x64xbf16, #tpu.memory_space<vmem>>, vector<8x8x64xbf16>
    %c2_53 = arith.constant 2 : index
    %c1_54 = arith.constant 1 : index
    %c0_55 = arith.constant 0 : index
    %45 = vector.load %arg12[%c2_53, %c1_54, %c0_55] : memref<10x16x64xbf16, #tpu.memory_space<vmem>>, vector<8x8x64xbf16>
    %c2_56 = arith.constant 2 : index
    %c2_57 = arith.constant 2 : index
    %c0_58 = arith.constant 0 : index
    %46 = vector.load %arg12[%c2_56, %c2_57, %c0_58] : memref<10x16x64xbf16, #tpu.memory_space<vmem>>, vector<8x8x64xbf16>
    %47 = tpu.concatenate %44, %45, %46 in 2 : vector<8x8x64xbf16>, vector<8x8x64xbf16>, vector<8x8x64xbf16> -> vector<8x8x192xbf16>
    %48 = vector.shape_cast %47 : vector<8x8x192xbf16> to vector<64x192xbf16>
    %c2_59 = arith.constant 2 : index
    %c0_60 = arith.constant 0 : index
    %c0_61 = arith.constant 0 : index
    %49 = vector.load %arg5[%c2_59, %c0_60, %c0_61] : memref<3x192x64xbf16, #tpu.memory_space<vmem>>, vector<1x192x64xbf16>
    %50 = vector.shape_cast %49 : vector<1x192x64xbf16> to vector<192x64xbf16>
    %cst_62 = arith.constant dense<0.000000e+00> : vector<64x64xf32>
    %51 = tpu.matmul %48, %50, %cst_62 {dimension_numbers = #tpu.dot_dimension_numbers<[1], [0], [0], [1], [0, 0, 1, 1], [], []>} : vector<64x192xbf16>, vector<192x64xbf16>, vector<64x64xf32> -> vector<64x64xf32>
    %52 = arith.addf %43, %51 : vector<64x64xf32>
    %c0_63 = arith.constant 0 : index
    %c0_64 = arith.constant 0 : index
    %53 = vector.load %arg6[%c0_63, %c0_64] : memref<1x64xf32, #tpu.memory_space<vmem>>, vector<1x64xf32>
    %54 = vector.broadcast %53 : vector<1x64xf32> to vector<64x64xf32>
    %55 = arith.mulf %52, %54 : vector<64x64xf32>
    %c0_65 = arith.constant 0 : index
    %c0_66 = arith.constant 0 : index
    %56 = vector.load %arg7[%c0_65, %c0_66] : memref<1x64xf32, #tpu.memory_space<vmem>>, vector<1x64xf32>
    %57 = vector.broadcast %56 : vector<1x64xf32> to vector<64x64xf32>
    %58 = arith.addf %55, %57 : vector<64x64xf32>
    %cst_67 = arith.constant 0.000000e+00 : f32
    %59 = vector.broadcast %cst_67 : f32 to vector<64x64xf32>
    %60 = arith.maximumf %58, %59 : vector<64x64xf32>
    %61 = arith.truncf %60 : vector<64x64xf32> to vector<64x64xbf16>
    %c0_68 = arith.constant 0 : index
    %c0_69 = arith.constant 0 : index
    %62 = vector.load %arg8[%c0_68, %c0_69] : memref<64x256xbf16, #tpu.memory_space<vmem>>, vector<64x256xbf16>
    %cst_70 = arith.constant dense<0.000000e+00> : vector<64x256xf32>
    %63 = tpu.matmul %61, %62, %cst_70 {dimension_numbers = #tpu.dot_dimension_numbers<[1], [0], [0], [1], [0, 0, 1, 1], [], []>} : vector<64x64xbf16>, vector<64x256xbf16>, vector<64x256xf32> -> vector<64x256xf32>
    %c0_71 = arith.constant 0 : index
    %c0_72 = arith.constant 0 : index
    %c0_73 = arith.constant 0 : index
    %c0_74 = arith.constant 0 : index
    %64 = vector.load %arg1[%c0_71, %c0_72, %c0_73, %c0_74] : memref<1x8x8x256xf32, #tpu.memory_space<vmem>>, vector<1x8x8x256xf32>
    %65 = vector.shape_cast %64 : vector<1x8x8x256xf32> to vector<8x8x256xf32>
    %66 = vector.shape_cast %65 : vector<8x8x256xf32> to vector<64x256xf32>
    %c0_75 = arith.constant 0 : index
    %c0_76 = arith.constant 0 : index
    %67 = vector.load %arg9[%c0_75, %c0_76] : memref<1x256xf32, #tpu.memory_space<vmem>>, vector<1x256xf32>
    %68 = vector.broadcast %67 : vector<1x256xf32> to vector<64x256xf32>
    %69 = arith.mulf %63, %68 : vector<64x256xf32>
    %c0_77 = arith.constant 0 : index
    %c0_78 = arith.constant 0 : index
    %70 = vector.load %arg10[%c0_77, %c0_78] : memref<1x256xf32, #tpu.memory_space<vmem>>, vector<1x256xf32>
    %71 = vector.broadcast %70 : vector<1x256xf32> to vector<64x256xf32>
    %72 = arith.addf %69, %71 : vector<64x256xf32>
    %73 = arith.addf %72, %66 : vector<64x256xf32>
    %cst_79 = arith.constant 0.000000e+00 : f32
    %74 = vector.broadcast %cst_79 : f32 to vector<64x256xf32>
    %75 = arith.maximumf %73, %74 : vector<64x256xf32>
    %76 = vector.shape_cast %75 : vector<64x256xf32> to vector<8x8x256xf32>
    %c0_80 = arith.constant 0 : index
    %c0_81 = arith.constant 0 : index
    %c0_82 = arith.constant 0 : index
    %c0_83 = arith.constant 0 : index
    %77 = vector.load %arg11[%c0_80, %c0_81, %c0_82, %c0_83] : memref<1x8x8x256xf32, #tpu.memory_space<vmem>>, vector<1x8x8x256xf32>
    %78 = vector.shape_cast %77 : vector<1x8x8x256xf32> to vector<8x8x256xf32>
    %79 = vector.shape_cast %76 : vector<8x8x256xf32> to vector<1x8x8x256xf32>
    tpu.vector_store %arg11[%c0_80, %c0_81, %c0_82, %c0_83], %79 {strides = array<i32>} : memref<1x8x8x256xf32, #tpu.memory_space<vmem>>, vector<1x8x8x256xf32>,
    return
  }
  func.func @transform_0(%arg0: i32) -> (i32, i32, i32, i32) {
    %c0_i32 = arith.constant 0 : i32
    %c0_i32_0 = arith.constant 0 : i32
    %c0_i32_1 = arith.constant 0 : i32
    %c0_i32_2 = arith.constant 0 : i32
    return %arg0, %c0_i32, %c0_i32_0, %c0_i32_1 : i32, i32, i32, i32
  }
  func.func @transform_1(%arg0: i32) -> (i32, i32) {
    %c0_i32 = arith.constant 0 : i32
    %c0_i32_0 = arith.constant 0 : i32
    %c0_i32_1 = arith.constant 0 : i32
    return %c0_i32, %c0_i32_0 : i32, i32
  }
  func.func @transform_2(%arg0: i32) -> (i32, i32) {
    %c0_i32 = arith.constant 0 : i32
    %c0_i32_0 = arith.constant 0 : i32
    %c0_i32_1 = arith.constant 0 : i32
    return %c0_i32, %c0_i32_0 : i32, i32
  }
  func.func @transform_3(%arg0: i32) -> (i32, i32) {
    %c0_i32 = arith.constant 0 : i32
    %c0_i32_0 = arith.constant 0 : i32
    %c0_i32_1 = arith.constant 0 : i32
    return %c0_i32, %c0_i32_0 : i32, i32
  }
  func.func @transform_4(%arg0: i32) -> (i32, i32, i32) {
    %c0_i32 = arith.constant 0 : i32
    %c0_i32_0 = arith.constant 0 : i32
    %c0_i32_1 = arith.constant 0 : i32
    %c0_i32_2 = arith.constant 0 : i32
    return %c0_i32, %c0_i32_0, %c0_i32_1 : i32, i32, i32
  }
  func.func @transform_5(%arg0: i32) -> (i32, i32) {
    %c0_i32 = arith.constant 0 : i32
    %c0_i32_0 = arith.constant 0 : i32
    %c0_i32_1 = arith.constant 0 : i32
    return %c0_i32, %c0_i32_0 : i32, i32
  }
  func.func @transform_6(%arg0: i32) -> (i32, i32) {
    %c0_i32 = arith.constant 0 : i32
    %c0_i32_0 = arith.constant 0 : i32
    %c0_i32_1 = arith.constant 0 : i32
    return %c0_i32, %c0_i32_0 : i32, i32
  }
  func.func @transform_7(%arg0: i32) -> (i32, i32) {
    %c0_i32 = arith.constant 0 : i32
    %c0_i32_0 = arith.constant 0 : i32
    %c0_i32_1 = arith.constant 0 : i32
    return %c0_i32, %c0_i32_0 : i32, i32
  }
  func.func @transform_8(%arg0: i32) -> (i32, i32) {
    %c0_i32 = arith.constant 0 : i32
    %c0_i32_0 = arith.constant 0 : i32
    %c0_i32_1 = arith.constant 0 : i32
    return %c0_i32, %c0_i32_0 : i32, i32
  }
  func.func @transform_9(%arg0: i32) -> (i32, i32) {
    %c0_i32 = arith.constant 0 : i32
    %c0_i32_0 = arith.constant 0 : i32
    %c0_i32_1 = arith.constant 0 : i32
    return %c0_i32, %c0_i32_0 : i32, i32
  }
  func.func @transform_10(%arg0: i32) -> (i32, i32, i32, i32) {
    %c0_i32 = arith.constant 0 : i32
    %c0_i32_0 = arith.constant 0 : i32
    %c0_i32_1 = arith.constant 0 : i32
    %c0_i32_2 = arith.constant 0 : i32
    return %arg0, %c0_i32, %c0_i32_0, %c0_i32_1 : i32, i32, i32, i32
  }
}

</mosaic_0001>

<bundles_post_ra>
// kernel: tpu_custom_call.1
= control target key start
LH: loop header
LB: loop body
LE: loop exit
PB: predicated region body
PF: predicated region fallthrough
CT: control target
= control target key end

     0   :  { %15 = vsyncpa [#allocation4], 0  ;;  %s3834_s0 = inlined_call_operand.vmem [shape: f32[2,8,8,256], index: 0, kind: input, shape index: {}]   ;;  %s3835_s1 = inlined_call_operand.vmem [shape: bf16[256,64], index: 1, kind: input, shape index: {}]   ;;  %s3836_s2 = inlined_call_operand.vmem [shape: f32[1,64], index: 2, kind: input, shape index: {}]   ;;  %s3837_s3 = inlined_call_operand.vmem [shape: f32[1,64], index: 3, kind: input, shape index: {}]   ;;  %s3838_s4 = inlined_call_operand.vmem [shape: bf16[3,192,64], index: 4, kind: input, shape index: {}]   ;;  %s3839_s5 = inlined_call_operand.vmem [shape: f32[1,64], index: 5, kind: input, shape index: {}]   ;;  %s3840_s6 = inlined_call_operand.vmem [shape: f32[1,64], index: 6, kind: input, shape index: {}]   ;;  %s3841_s7 = inlined_call_operand.vmem [shape: bf16[64,256], index: 7, kind: input, shape index: {}]   ;;  %s3842_s8 = inlined_call_operand.vmem [shape: f32[1,256], index: 8, kind: input, shape index: {}]   ;;  %s3843_s9 = inlined_call_operand.vmem [shape: f32[1,256], index: 9, kind: input, shape index: {}]   ;;  %s3844_s10 = inlined_call_operand.hbm [shape: f32[2,8,8,256], index: 10, kind: output, shape index: {}]  }
   0x1   :  { %17 = vsyncpa [#allocation4 + $0x1], 0  ;;  %s2898_s13 = smov 0   ;;  %s2900_s14 = smov 0  }
   0x2   :  { %s2902_s15 = smov 0   ;;  %s2904_s16 = smov 0  }
   0x3 LB: > { %s2919_s17 = sadd.s32 4294967295, %s2837_s16   ;;  %s2333_s18 = sadd.s32 4294967294, %s2837_s16   ;;  %s2837_s16 = sphi %s2904_s16, %s3889_s16   ;;  %s2833_s15 = sphi %s2902_s15, %s3888_s15   ;;  %s2829_s14 = sphi %s2900_s14, %s3887_s14   ;;  %s2825_s13 = sphi %s2898_s13, %s3886_s13  }
   0x4   : > { %s2923_s19 = sadd.s32 1, %s2837_s16   ;;  %s245_s20 = sadd.s32 1, %s2833_s15 }
   0x5   : > { %s242_s21 = ssub.s32 %s2837_s16, %s2923_s19  ;;  %p255_p0 = scmp.ne.s32.totalorder %s2833_s15, %s2829_s14 }
   0x6   : > { %p243_p1 = scmp.eq.s32.totalorder %s242_s21, 0  ;;  %p256_p2 = scmp.eq.s32.totalorder %s2919_s17, 1 }
   0x7   : > { %p261_p3 = scmp.ne.s32.totalorder %s2829_s14, %s2825_s13  ;;  %p262_p4 = scmp.eq.s32.totalorder %s2333_s18, 1 }
   0x8   : > { %s2934_s22 = scalar_select %p243_p1, %s2833_s15, %s245_s20  }
   0x9   : > { %p2936_p5 = por %p256_p2, %p255_p0  ;;  %p2940_p6 = por %p262_p4, %p261_p3 }
   0xa   : > { %p2336_p7 = scmp.ge.s32.totalorder %s2837_s16, 1  ;;  %p315_p8 = scmp.lt.s32.totalorder %s2837_s16, 3 }
   0xc   : > { %p316_p9 = pnand %p2336_p7, %p315_p8 }
   0xe   : > { %319 = sbr.rel (%p316_p9) target bundleno = 822 (0x336), region = 60 }
  0x13   : > { %v2661_v0 = vld [vmem:[%s3835_s1 + $0x38] sm:$0xff]  ;;  %v2660_v1 = vld [vmem:[%s3835_s1 + $0x30] sm:$0xff]  ;;  %v2659_v2 = vld [vmem:[%s3835_s1 + $0x28] sm:$0xff]  ;;  %p353_p10 = scmp.lt.s32.totalorder %s2919_s17, 1  ;;  %vm608_vm0 = vcmask 516096   ;;  %vm601_vm3 = vcmask 519168  }
  0x14   : > { %2715 = vmatpush.bf16.msra.mxu1 %v2661_v0  ;;  %511 = vmatpush.bf16.msra.mxu0 %v2661_v0  ;;  %v2658_v3 = vld [vmem:[%s3835_s1 + $0x20] sm:$0xff]  ;;  %v2657_v4 = vld [vmem:[%s3835_s1 + $0x18] sm:$0xff]  ;;  %v2656_v5 = vld [vmem:[%s3835_s1 + $0x10] sm:$0xff]  ;;  %vm609_vm1 = vsmask.f32 256  ;;  %v2839_v45 = vmov 0  }
  0x15   : > { %s354_s21 = scalar_select %p353_p10, %s2919_s17, 1  ;;  %v2655_v6 = vld [vmem:[%s3835_s1 + $0x8] sm:$0xff]  ;;  %v2654_v7 = vld [vmem:[%s3835_s1] sm:$0xff]  ;;  %v2669_v12 = vld [vmem:[%s3835_s1 + $0x78] sm:$0xff]  ;;  %vm635_vm2 = vsmask.f32 7938 }
  0x16   : > { %v2668_v15 = vld [vmem:[%s3835_s1 + $0x70] sm:$0xff]  ;;  %v2667_v16 = vld [vmem:[%s3835_s1 + $0x68] sm:$0xff]  ;;  %v2666_v17 = vld [vmem:[%s3835_s1 + $0x60] sm:$0xff]  ;;  %602 = vst.msk [vmem:[#allocation2] sm:$0xf] %vm601_vm3, %v2839_v45  ;;  %vm967_vm7 = vcmask 523264  }
  0x17   : > { %s2653_s27 = sshll.u32 %s354_s21, 7  ;;  %v2665_v22 = vld [vmem:[%s3835_s1 + $0x58] sm:$0xff]  ;;  %v2664_v25 = vld [vmem:[%s3835_s1 + $0x50] sm:$0xff]  ;;  %v2663_v26 = vld [vmem:[%s3835_s1 + $0x48] sm:$0xff]  ;;  %603 = vst.msk [vmem:[#allocation2 + $0x4] sm:$0xf] %vm601_vm3, %v2839_v45 }
  0x18   : > { %2716 = vmatpush.bf16.msra.mxu1 %v2660_v1  ;;  %512 = vmatpush.bf16.msra.mxu0 %v2660_v1  ;;  %s2972_s12 = scalar_lea.vmem %s3834_s0, %s2653_s27  ;;  %v2662_v27 = vld [vmem:[%s3835_s1 + $0x40] sm:$0xff]  ;;  %vm3019_vm4 = vmand %vm608_vm0, %vm609_vm1  ;;  %v611_v42 = vld [vmem:[#allocation2 + $0x8] sm:$0x1]  ;;  %605 = vst.msk [vmem:[#allocation2 + $0x48] sm:$0xf] %vm601_vm3, %v2839_v45  ;;  %s2840_s28 = smov 64  }
  0x19   : > { %v367_v8 = vld [vmem:[%s2972_s12 + $0x40] sm:$0xff]  ;;  %v369_v9 = vld [vmem:[%s2972_s12 + $0x50] sm:$0xff]  ;;  %v360_v28 = vld [vmem:[%s2972_s12 + $0x8] sm:$0xff]  ;;  %v612_v46 = vsel %vm3019_vm4, 0, %v611_v42  ;;  %606 = vst.msk [vmem:[#allocation2 + $0x4c] sm:$0xf] %vm601_vm3, %v2839_v45 }
  0x1a   : > { %v359_v10 = vld [vmem:[%s2972_s12] sm:$0xff]  ;;  %v361_v11 = vld [vmem:[%s2972_s12 + $0x10] sm:$0xff]  ;;  %v379_v13 = vpack.c.bf16 %v369_v9, %v367_v8  ;;  %v362_v29 = vld [vmem:[%s2972_s12 + $0x18] sm:$0xff]  ;;  %613 = vst [vmem:[#allocation2 + $0x8] sm:$0x1] %v612_v46  ;;  %s350_s29 = sand.u32 1, %s2829_s14  }
  0x1b   : > { %v375_v14 = vpack.c.bf16 %v361_v11, %v359_v10  ;;  %v371_v18 = vld [vmem:[%s2972_s12 + $0x60] sm:$0xff]  ;;  %v373_v19 = vld [vmem:[%s2972_s12 + $0x70] sm:$0xff]  ;;  %v376_v30 = vpack.c.bf16 %v362_v29, %v360_v28  ;;  %v364_v31 = vld [vmem:[%s2972_s12 + $0x28] sm:$0xff]  ;;  %s2337_s30 = sshll.u32 %s350_s29, 7  ;;  %s2714_s18 = sshll.u32 %s2919_s17, 7 }
  0x1c   : > { %2717 = vmatpush.bf16.msra.mxu1 %v2659_v2  ;;  %513 = vmatpush.bf16.msra.mxu0 %v2659_v2  ;;  %v363_v20 = vld [vmem:[%s2972_s12 + $0x20] sm:$0xff]  ;;  %v365_v21 = vld [vmem:[%s2972_s12 + $0x30] sm:$0xff]  ;;  %v381_v23 = vpack.c.bf16 %v373_v19, %v371_v18  ;;  %v366_v32 = vld [vmem:[%s2972_s12 + $0x38] sm:$0xff]  ;;  %s3739_s11 = scalar_lea.vmem [#allocation3], %s2337_s30  ;;  %s2256_s26 = scalar_lea.sflag [#allocation4], %s350_s29 }
  0x1d   : > { %v377_v24 = vpack.c.bf16 %v365_v21, %v363_v20  ;;  %v378_v33 = vpack.c.bf16 %v366_v32, %v364_v31  ;;  %v368_v34 = vld [vmem:[%s2972_s12 + $0x48] sm:$0xff]  ;;  %v370_v35 = vld [vmem:[%s2972_s12 + $0x58] sm:$0xff]  ;;  %vm3029_vm5 = vmand %vm608_vm0, %vm635_vm2  ;;  %s2268_s25 = sshll.u32 %s3739_s11, 4  ;;  %s2795_s20 = scalar_lea.hbm %s3844_s10, 256  ;;  %s2269_s25 = int_to_ptr.vmem [resolvable:$true] %s2268_s25 }
  0x1e   : > { %v380_v36 = vpack.c.bf16 %v370_v35, %v368_v34  ;;  %v372_v37 = vld [vmem:[%s2972_s12 + $0x68] sm:$0xff]  ;;  %v374_v38 = vld [vmem:[%s2972_s12 + $0x78] sm:$0xff]  ;;  %v614_v50 = vld [vmem:[#allocation2 + $0x10] sm:$0x1] }
  0x1f   : > { %v382_v39 = vpack.c.bf16 %v374_v38, %v372_v37  ;;  %v637_v43 = vld [vmem:[#allocation2 + $0xc] sm:$0x1]  ;;  %v640_v51 = vld [vmem:[#allocation2 + $0x14] sm:$0x1]  ;;  %v615_v52 = vsel %vm3019_vm4, 0, %v614_v50  ;;  %v2681_v54 = vld [vmem:[%s3838_s4 + $0x58] sm:$0xff] }
  0x20   : > { %2718 = vmatpush.bf16.msra.mxu1 %v2658_v3  ;;  %514 = vmatpush.bf16.msra.mxu0 %v2658_v3  ;;  %v638_v48 = vsel %vm3029_vm5, 0, %v637_v43  ;;  %v641_v53 = vsel %vm3029_vm5, 0, %v640_v51  ;;  %616 = vst [vmem:[#allocation2 + $0x10] sm:$0x1] %v615_v52  ;;  %v617_v56 = vld [vmem:[#allocation2 + $0x18] sm:$0x1]  ;;  %vm3086_vm6 = vmand %vm601_vm3, %vm635_vm2 }
  0x21   : > { %639 = vst [vmem:[#allocation2 + $0xc] sm:$0x1] %v638_v48  ;;  %v643_v57 = vld [vmem:[#allocation2 + $0x1c] sm:$0x1]  ;;  %v2680_v58 = vld [vmem:[%s3838_s4 + $0x50] sm:$0xff]  ;;  %v618_v59 = vsel %vm3019_vm4, 0, %v617_v56 }
  0x22   : > { %642 = vst [vmem:[#allocation2 + $0x14] sm:$0x1] %v641_v53  ;;  %v644_v60 = vsel %vm3029_vm5, 0, %v643_v57  ;;  %v2679_v62 = vld [vmem:[%s3838_s4 + $0x48] sm:$0xff]  ;;  %v3062_v63 = vld [vmem:[%s3836_s2] ss:$0 sm:$0xff] }
  0x23   : > { %619 = vst [vmem:[#allocation2 + $0x18] sm:$0x1] %v618_v59  ;;  %v620_v1 = vld [vmem:[#allocation2 + $0x20] sm:$0x1]  ;;  %v646_v2 = vld [vmem:[#allocation2 + $0x24] sm:$0x1] }
  0x24   : > { %2719 = vmatpush.bf16.msra.mxu1 %v2657_v4  ;;  %515 = vmatpush.bf16.msra.mxu0 %v2657_v4  ;;  %645 = vst [vmem:[#allocation2 + $0x1c] sm:$0x1] %v644_v60  ;;  %v2678_v3 = vld [vmem:[%s3838_s4 + $0x40] sm:$0xff]  ;;  %v626_v38 = vld [vmem:[#allocation2 + $0x30] sm:$0x1] }
  0x25   : > { %v3090_v32 = vld [vmem:[#allocation2 + $0x4] sm:$0x1]  ;;  %v627_v42 = vsel %vm3019_vm4, 0, %v626_v38 }
  0x26   : > { %v840_v48 = vunpack.c.l.b16 %v3090_v32  ;;  %628 = vst [vmem:[#allocation2 + $0x30] sm:$0x1] %v627_v42 }
  0x28   : > { %2720 = vmatpush.bf16.msra.mxu1 %v2656_v5  ;;  %516 = vmatpush.bf16.msra.mxu0 %v2656_v5  ;;  %v3070_v5 = vld [vmem:[%s3837_s3] ss:$0 sm:$0xff] }
  0x29   : > { %v760_v56 = vld [vmem:[#allocation2 + $0x14] sm:$0x1] }
  0x2c   : > { %2721 = vmatpush.bf16.msra.mxu1 %v2655_v6  ;;  %517 = vmatpush.bf16.msra.mxu0 %v2655_v6  ;;  %v621_v6 = vsel %vm3019_vm4, 0, %v620_v1 }
  0x2d   : > { %622 = vst [vmem:[#allocation2 + $0x20] sm:$0x1] %v621_v6 }
  0x30   : > { %2722 = vmatpush.bf16.msra.mxu1 %v2654_v7  ;;  %518 = vmatpush.bf16.msra.mxu0 %v2654_v7  ;;  %v647_v7 = vsel %vm3029_vm5, 0, %v646_v2 }
  0x31   : > { %648 = vst [vmem:[#allocation2 + $0x24] sm:$0x1] %v647_v7 }
  0x33   : > { %529 = vmatmul.bf16.vlgmr.msra.gmra.mxu1 %v379_v13  ;;  %519 = vmatmul.bf16.vlgmr.msra.gmra.mxu0 %v375_v14  ;;  %v623_v13 = vld [vmem:[#allocation2 + $0x28] sm:$0x1]  ;;  %v649_v14 = vld [vmem:[#allocation2 + $0x2c] sm:$0x1] }
  0x34   : > { %540 = vmatpush.bf16.msrb.mxu1 %v2669_v12  ;;  %1564 = vmatpush.bf16.msrb.mxu0 %v2681_v54  ;;  %v650_v18 = vsel %vm3029_vm5, 0, %v649_v14  ;;  %v757_v54 = vld [vmem:[#allocation2 + $0x10] sm:$0xf] }
  0x35   : > { %651 = vst [vmem:[#allocation2 + $0x2c] sm:$0x1] %v650_v18 }
  0x38   : > { %541 = vmatpush.bf16.msrb.mxu1 %v2668_v15  ;;  %1565 = vmatpush.bf16.msrb.mxu0 %v2680_v58 }
  0x3c   : > { %542 = vmatpush.bf16.msrb.mxu1 %v2667_v16  ;;  %1566 = vmatpush.bf16.msrb.mxu0 %v2679_v62 }
  0x40   : > { %543 = vmatpush.bf16.msrb.mxu1 %v2666_v17  ;;  %1567 = vmatpush.bf16.msrb.mxu0 %v2678_v3  ;;  %v624_v17 = vsel %vm3019_vm4, 0, %v623_v13 }
  0x41   : > { %625 = vst [vmem:[#allocation2 + $0x28] sm:$0x1] %v624_v17  ;;  %v655_v17 = vld [vmem:[#allocation2 + $0x3c] sm:$0x1] }
  0x43   : > { %534 = vmatmul.bf16.gmra.mxu1 %v381_v23  ;;  %524 = vmatmul.bf16.gmra.mxu0 %v377_v24 }
  0x44   : > { %544 = vmatpush.bf16.msrb.mxu1 %v2665_v22 }
  0x48   : > { %545 = vmatpush.bf16.msrb.mxu1 %v2664_v25  ;;  %v751_v25 = vld [vmem:[#allocation2 + $0x8] sm:$0xf] }
  0x4c   : > { %546 = vmatpush.bf16.msrb.mxu1 %v2663_v26  ;;  %v754_v26 = vld [vmem:[#allocation2 + $0xc] sm:$0x1] }
  0x50   : > { %547 = vmatpush.bf16.msrb.mxu1 %v2662_v27 }
  0x53   : > { %548 = vmatmul.bf16.vlgmr.msrb.gmra.mxu1 %v376_v30 }
  0x63   : > { %553 = vmatmul.bf16.gmra.mxu1 %v378_v33  ;;  %v815_v33 = vld [vmem:[#allocation2] sm:$0xe] }
  0x64   : > { %v943_v50 = vunpack.c.l.b16 %v815_v33 }
  0x66   : > { %v951_v60 = vpack.c.b16 %v840_v48, %v943_v50  ;;  %v632_v50 = vld [vmem:[#allocation2 + $0x40] sm:$0x1] }
  0x68   : > { %v959_v14 = vrot.slane %v951_v60, 1 }
  0x6a   : > { %v1001_v33 = vunpack.c.l.b16 %v959_v14  ;;  %v772_v14 = vld [vmem:[#allocation2 + $0x24] sm:$0x1] }
  0x73   : > { %558 = vmatmul.bf16.gmra.mxu1 %v380_v36 }
  0x83   : > { %563 = vmatmul.bf16.gmra.mxu1 %v382_v39  ;;  %v652_v39 = vld [vmem:[#allocation2 + $0x34] sm:$0x1] }
  0x84   : > { %v653_v43 = vsel %vm3029_vm5, 0, %v652_v39 }
  0x85   : > { %654 = vst [vmem:[#allocation2 + $0x34] sm:$0x1] %v653_v43 }
  0xb0   : > { %v3017_v40 = vpop.f32.mrf.mxu1  ;;  %v520_v61 = vpop.f32.mrf.mxu0 }
  0xb8   : > { %v3023_v44 = vpop.f32.mrf.mxu1  ;;  %v522_v9 = vpop.f32.mrf.mxu0 }
  0xc0   : > { %v3038_v49 = vpop.f32.mrf.mxu1  ;;  %v525_v27 = vpop.f32.mrf.mxu0 }
  0xc8   : > { %v3047_v55 = vpop.f32.mrf.mxu1 }
  0xd0   : > { %v549_v0 = vpop.f32.mrf.mxu1 }
  0xd1   : > { %v550_v4 = vadd.f32 %v549_v0, %v520_v61  ;;  %v527_v61 = vpop.f32.mrf.mxu0 }
  0xd3   : > { %v573_v8 = vmul.f32 %v3062_v63, %v550_v4 }
  0xd5   : > { %v585_v10 = vadd.f32 %v3070_v5, %v573_v8 }
  0xd7   : > { %v593_v11 = vmax.f32 %v585_v10, 0.0 }
  0xd8   : > { %v551_v12 = vpop.f32.mrf.mxu1 }
  0xd9   : > { %v661_v15 = vpack.c.bf16 %v593_v11, %v593_v11  ;;  %v552_v16 = vadd.f32 %v551_v12, %v522_v9 }
  0xdb   : > { %v670_v19 = vshrl.u32 %v661_v15, 16  ;;  %v574_v20 = vmul.f32 %v3062_v63, %v552_v16  ;;  %v673_v22 = vshll.u32 %v661_v15, 16  ;;  %v629_v16 = vld [vmem:[#allocation2 + $0x38] sm:$0x1] }
  0xdd   : > { %v672_v21 = vrot.slane %v670_v19, 7  ;;  %v586_v23 = vadd.f32 %v3070_v5, %v574_v20 }
  0xdf   : > { %v675_v28 = vor.u32 %v673_v22, %v672_v21  ;;  %v676_v29 = vrot.slane %v672_v21, 4  ;;  %v594_v30 = vmax.f32 %v586_v23, 0.0  ;;  %v3122_v22 = vld [vmem:[%s3838_s4 + $0xb8] sm:$0xff] }
  0xe0   : > { %v554_v31 = vpop.f32.mrf.mxu1  ;;  %v763_v23 = vld [vmem:[#allocation2 + $0x18] sm:$0xf]  ;;  %2723 = vmatpush.bf16.msra.mxu3 %v3122_v22 }
  0xe1   : > { %v752_v34 = vsel %vm3086_vm6, %v675_v28, %v751_v25  ;;  %v755_v35 = vsel %vm3019_vm4, %v676_v29, %v754_v26  ;;  %v662_v36 = vpack.c.bf16 %v594_v30, %v594_v30  ;;  %v555_v37 = vadd.f32 %v554_v31, %v525_v27  ;;  %v766_v25 = vld [vmem:[#allocation2 + $0x1c] sm:$0x1] }
  0xe2   : > { %753 = vst [vmem:[#allocation2 + $0x8] sm:$0xf] %v752_v34  ;;  %v630_v27 = vsel %vm3019_vm4, 0, %v629_v16  ;;  %v656_v28 = vsel %vm3029_vm5, 0, %v655_v17 }
  0xe3   : > { %756 = vst [vmem:[#allocation2 + $0xc] sm:$0x1] %v755_v35  ;;  %v678_v45 = vshrl.u32 %v662_v36, 16  ;;  %v575_v46 = vmul.f32 %v3062_v63, %v555_v37  ;;  %v681_v52 = vshll.u32 %v662_v36, 16 }
  0xe4   : > { %631 = vst [vmem:[#allocation2 + $0x38] sm:$0x1] %v630_v27 }
  0xe5   : > { %v680_v51 = vrot.slane %v678_v45, 7  ;;  %v587_v53 = vadd.f32 %v3070_v5, %v575_v46  ;;  %657 = vst [vmem:[#allocation2 + $0x3c] sm:$0x1] %v656_v28 }
  0xe7   : > { %v683_v57 = vor.u32 %v681_v52, %v680_v51  ;;  %v684_v58 = vrot.slane %v680_v51, 4  ;;  %v595_v59 = vmax.f32 %v587_v53, 0.0 }
  0xe8   : > { %v556_v62 = vpop.f32.mrf.mxu1 }
  0xe9   : > { %v758_v0 = vsel %vm3086_vm6, %v683_v57, %v757_v54  ;;  %v761_v1 = vsel %vm3019_vm4, %v684_v58, %v760_v56  ;;  %v663_v2 = vpack.c.bf16 %v595_v59, %v595_v59  ;;  %v557_v3 = vadd.f32 %v556_v62, %v527_v61  ;;  %v1040_v4 = vld [vmem:[#allocation2 + $0x8] sm:$0xf]  ;;  %v3144_v57 = vld [vmem:[%s3838_s4 + $0xb0] sm:$0xff] }
  0xea   : > { %v816_v6 = vld [vmem:[#allocation2 + $0x8] sm:$0xe]  ;;  %759 = vst [vmem:[#allocation2 + $0x10] sm:$0xf] %v758_v0  ;;  %v3109_v7 = vld [vmem:[#allocation2 + $0xc] sm:$0x1]  ;;  %v1080_v8 = vunpack.c.l.b16 %v1040_v4  ;;  %2724 = vmatpush.bf16.msra.mxu3 %v3144_v57 }
  0xeb   : > { %v3111_v9 = vld [vmem:[#allocation2 + $0xc] sm:$0x1]  ;;  %v944_v10 = vunpack.c.l.b16 %v816_v6  ;;  %762 = vst [vmem:[#allocation2 + $0x14] sm:$0x1] %v761_v1  ;;  %v686_v11 = vshrl.u32 %v663_v2, 16  ;;  %v576_v12 = vmul.f32 %v3062_v63, %v557_v3  ;;  %v3851_v13 = vunpack.c.l.b16 %v3109_v7 }
  0xec   : > { %v842_v15 = vunpack.c.l.b16 %v3111_v9  ;;  %v689_v19 = vshll.u32 %v663_v2, 16  ;;  %v633_v2 = vsel %vm3019_vm4, 0, %v632_v50  ;;  %v658_v3 = vld [vmem:[#allocation2 + $0x44] sm:$0x1] }
  0xed   : > { %v688_v18 = vrot.slane %v686_v11, 7  ;;  %v588_v20 = vadd.f32 %v3070_v5, %v576_v12  ;;  %v1096_v21 = vpack.c.b16 %v3851_v13, %v1080_v8  ;;  %634 = vst [vmem:[#allocation2 + $0x40] sm:$0x1] %v633_v2  ;;  %v3162_v11 = vld [vmem:[%s3838_s4 + $0xa8] sm:$0xff]  ;;  %v769_v12 = vld [vmem:[#allocation2 + $0x20] sm:$0xf] }
  0xee   : > { %v952_v26 = vpack.c.b16 %v842_v15, %v944_v10  ;;  %v659_v10 = vsel %vm3029_vm5, 0, %v658_v3  ;;  %2725 = vmatpush.bf16.msra.mxu3 %v3162_v11 }
  0xef   : > { %v691_v29 = vor.u32 %v689_v19, %v688_v18  ;;  %v692_v30 = vrot.slane %v688_v18, 4  ;;  %v596_v31 = vmax.f32 %v588_v20, 0.0  ;;  %v1105_v35 = vshrl.u32 %v1096_v21, 16  ;;  %660 = vst [vmem:[#allocation2 + $0x44] sm:$0x1] %v659_v10 }
  0xf0   : > { %v559_v34 = vpop.f32.mrf.mxu1  ;;  %v1107_v36 = vshll.u32 %v1096_v21, 16  ;;  %v960_v37 = vrot.slane %v952_v26, 1 }
  0xf1   : > { %v764_v38 = vsel %vm3086_vm6, %v691_v29, %v763_v23  ;;  %v767_v39 = vsel %vm3019_vm4, %v692_v30, %v766_v25  ;;  %v664_v42 = vpack.c.bf16 %v596_v31, %v596_v31  ;;  %v560_v43 = vadd.f32 %v559_v34, %v3017_v40  ;;  %v3136_v45 = vld [vmem:[#allocation2 + $0x10] sm:$0xf]  ;;  %v3179_v29 = vld [vmem:[%s3838_s4 + $0xa0] sm:$0xff] }
  0xf2   : > { %v817_v46 = vld [vmem:[#allocation2 + $0x10] sm:$0xe]  ;;  %765 = vst [vmem:[#allocation2 + $0x18] sm:$0xf] %v764_v38  ;;  %v1109_v51 = vrot.slane %v1107_v36, 1  ;;  %v1003_v52 = vunpack.c.l.b16 %v960_v37  ;;  %v1082_v54 = vunpack.c.l.b16 %v3136_v45  ;;  %2726 = vmatpush.bf16.msra.mxu3 %v3179_v29 }
  0xf3   : > { %v3138_v53 = vld [vmem:[#allocation2 + $0x14] sm:$0x1]  ;;  %v945_v56 = vunpack.c.l.b16 %v817_v46  ;;  %768 = vst [vmem:[#allocation2 + $0x1c] sm:$0x1] %v767_v39  ;;  %v694_v58 = vshrl.u32 %v664_v42, 16  ;;  %v697_v40 = vshll.u32 %v664_v42, 16  ;;  %v577_v59 = vmul.f32 %v3062_v63, %v560_v43 }
  0xf4   : > { %v3850_v60 = vunpack.c.l.b16 %v3138_v53  ;;  %v3148_v61 = vld [vmem:[#allocation2 + $0x14] sm:$0x1]  ;;  %v1110_v62 = vor.u32 %v1109_v51, %v1105_v35  ;;  %v1436_v0 = vpack.c.b16 %v1003_v52, %v1001_v33 }
  0xf5   : > { %v844_v1 = vunpack.c.l.b16 %v3148_v61  ;;  %v696_v4 = vrot.slane %v694_v58, 7  ;;  %v589_v6 = vadd.f32 %v3070_v5, %v577_v59 }
  0xf6   : > { %v1097_v8 = vpack.c.b16 %v3850_v60, %v1082_v54  ;;  %1160 = vrot.lane.b32.xlu0 %v1110_v62, %s2840_s28  ;;  %2528 = vmatmul.msk.bf16.vlgmr.msrb.gmra.mxu0 %vm967_vm7, %v1436_v0  ;;  %v775_v54 = vld [vmem:[#allocation2 + $0x28] sm:$0xf] }
  0xf7   : > { %v699_v16 = vor.u32 %v697_v40, %v696_v4  ;;  %v700_v17 = vrot.slane %v696_v4, 4  ;;  %v597_v18 = vmax.f32 %v589_v6, 0.0  ;;  %v953_v47 = vpack.c.b16 %v844_v1, %v945_v56  ;;  %v778_v56 = vld [vmem:[#allocation2 + $0x2c] sm:$0x1] }
  0xf8   : > { %v561_v19 = vpop.f32.mrf.mxu1  ;;  %v1114_v20 = vshll.u32 %v1097_v8, 16  ;;  %v1112_v30 = vshrl.u32 %v1097_v8, 16 }
  0xf9   : > { %v770_v21 = vsel %vm3086_vm6, %v699_v16, %v769_v12  ;;  %v773_v23 = vsel %vm3019_vm4, %v700_v17, %v772_v14  ;;  %v665_v25 = vpack.c.bf16 %v597_v18, %v597_v18  ;;  %v562_v26 = vadd.f32 %v561_v19, %v3023_v44  ;;  %v3174_v27 = vld [vmem:[#allocation2 + $0x18] sm:$0xf] }
  0xfa   : > { %v818_v28 = vld [vmem:[#allocation2 + $0x18] sm:$0xe]  ;;  %771 = vst [vmem:[#allocation2 + $0x20] sm:$0xf] %v770_v21  ;;  %v1116_v31 = vrot.slane %v1114_v20, 1  ;;  %v1084_v34 = vunpack.c.l.b16 %v3174_v27  ;;  %v961_v43 = vrot.slane %v953_v47, 1 }
  0xfb   : > { %v3181_v33 = vld [vmem:[#allocation2 + $0x1c] sm:$0x1]  ;;  %v946_v35 = vunpack.c.l.b16 %v818_v28  ;;  %774 = vst [vmem:[#allocation2 + $0x24] sm:$0x1] %v773_v23  ;;  %v702_v36 = vshrl.u32 %v665_v25, 16  ;;  %v578_v44 = vmul.f32 %v3062_v63, %v562_v26  ;;  %v705_v50 = vshll.u32 %v665_v25, 16 }
  0xfc   : > { %v3849_v37 = vunpack.c.l.b16 %v3181_v33  ;;  %v3186_v38 = vld [vmem:[#allocation2 + $0x1c] sm:$0x1]  ;;  %v1117_v39 = vor.u32 %v1116_v31, %v1112_v30  ;;  %v1005_v4 = vunpack.c.l.b16 %v961_v43  ;;  %v784_v43 = vld [vmem:[#allocation2 + $0x34] sm:$0x1] }
  0xfd   : > { %v3852_v42 = vunpack.c.l.b16 %v3186_v38  ;;  %v704_v46 = vrot.slane %v702_v36, 7  ;;  %v590_v51 = vadd.f32 %v3070_v5, %v578_v44 }
  0xfe   : > { %v1098_v52 = vpack.c.b16 %v3849_v37, %v1084_v34  ;;  %1162 = vrot.lane.b32.xlu0 %v1117_v39, %s2840_s28  ;;  %v781_v39 = vld [vmem:[#allocation2 + $0x30] sm:$0xf] }
  0xff   : > { %v954_v58 = vpack.c.b16 %v3852_v42, %v946_v35  ;;  %v707_v40 = vor.u32 %v705_v50, %v704_v46  ;;  %v708_v59 = vrot.slane %v704_v46, 4  ;;  %v598_v62 = vmax.f32 %v590_v51, 0.0 }
 0x100   : > { %v564_v0 = vpop.f32.mrf.mxu1  ;;  %v1121_v2 = vshll.u32 %v1098_v52, 16  ;;  %v1119_v17 = vshrl.u32 %v1098_v52, 16 }
 0x101   : > { %v962_v3 = vrot.slane %v954_v58, 1  ;;  %v776_v6 = vsel %vm3086_vm6, %v707_v40, %v775_v54  ;;  %v779_v8 = vsel %vm3019_vm4, %v708_v59, %v778_v56  ;;  %v666_v10 = vpack.c.bf16 %v598_v62, %v598_v62  ;;  %v3201_v14 = vld [vmem:[#allocation2 + $0x20] sm:$0xf] }
 0x102   : > { %v565_v12 = vadd.f32 %v564_v0, %v3038_v49  ;;  %v819_v16 = vld [vmem:[#allocation2 + $0x20] sm:$0xe]  ;;  %777 = vst [vmem:[#allocation2 + $0x28] sm:$0xf] %v776_v6  ;;  %v1123_v18 = vrot.slane %v1121_v2, 1  ;;  %v1086_v47 = vunpack.c.l.b16 %v3201_v14 }
 0x103   : > { %v1007_v19 = vunpack.c.l.b16 %v962_v3  ;;  %v3203_v20 = vld [vmem:[#allocation2 + $0x24] sm:$0x1]  ;;  %780 = vst [vmem:[#allocation2 + $0x2c] sm:$0x1] %v779_v8  ;;  %v710_v21 = vshrl.u32 %v666_v10, 16  ;;  %v947_v31 = vunpack.c.l.b16 %v819_v16  ;;  %v713_v35 = vshll.u32 %v666_v10, 16 }
 0x104   : > { %v579_v23 = vmul.f32 %v3062_v63, %v565_v12  ;;  %v3848_v25 = vunpack.c.l.b16 %v3203_v20  ;;  %v3208_v26 = vld [vmem:[#allocation2 + $0x24] sm:$0x1]  ;;  %v1124_v49 = vor.u32 %v1123_v18, %v1119_v17  ;;  %v3218_v58 = vld [vmem:[#allocation2] sm:$0xf]  ;;  %v3227_v6 = vld [vmem:[#allocation2 + $0x8] sm:$0xf] }
 0x105   : > { %v1438_v28 = vpack.c.b16 %v1007_v19, %v1005_v4  ;;  %v3846_v30 = vunpack.c.l.b16 %v3208_v26  ;;  %v712_v34 = vrot.slane %v710_v21, 7  ;;  %v3229_v8 = vld [vmem:[#allocation2 + $0x18] sm:$0xf] }
 0x106   : > { %v591_v36 = vadd.f32 %v3070_v5, %v579_v23  ;;  %v1099_v44 = vpack.c.b16 %v3848_v25, %v1086_v47  ;;  %1164 = vrot.lane.b32.xlu1 %v1124_v49, %s2840_s28  ;;  %v839_v23 = vunpack.c.l.b16 %v3218_v58 }
 0x107   : > { %2529 = vmatmul.msk.bf16.gmra.mxu0 %vm967_vm7, %v1438_v28  ;;  %v715_v46 = vor.u32 %v713_v35, %v712_v34  ;;  %v716_v50 = vrot.slane %v712_v34, 4  ;;  %v955_v56 = vpack.c.b16 %v3846_v30, %v947_v31 }
 0x108   : > { %v599_v51 = vmax.f32 %v591_v36, 0.0  ;;  %v566_v52 = vpop.f32.mrf.mxu1  ;;  %v1128_v54 = vshll.u32 %v1099_v44, 16  ;;  %v1126_v10 = vshrl.u32 %v1099_v44, 16 }
 0x109   : > { %v782_v40 = vsel %vm3086_vm6, %v715_v46, %v781_v39  ;;  %v785_v59 = vsel %vm3019_vm4, %v716_v50, %v784_v43  ;;  %v567_v0 = vadd.f32 %v566_v52, %v3047_v55  ;;  %v3225_v2 = vld [vmem:[#allocation2 + $0x28] sm:$0xf]  ;;  %v963_v31 = vrot.slane %v955_v56, 1  ;;  %v3238_v43 = vld [vmem:[#allocation2 + $0x1c] sm:$0x1] }
 0x10a   : > { %v667_v62 = vpack.c.bf16 %v599_v51, %v599_v51  ;;  %v820_v3 = vld [vmem:[#allocation2 + $0x28] sm:$0xe]  ;;  %783 = vst [vmem:[#allocation2 + $0x30] sm:$0xf] %v782_v40  ;;  %v1130_v12 = vrot.slane %v1128_v54, 1  ;;  %v1088_v17 = vunpack.c.l.b16 %v3225_v2  ;;  %v841_v51 = vunpack.c.l.b16 %v3227_v6 }
 0x10b   : > { %v1060_v4 = vld [vmem:[#allocation2 + $0x28] sm:$0xe]  ;;  %v1052_v16 = vld [vmem:[#allocation2 + $0x2c] sm:$0x1]  ;;  %v948_v18 = vunpack.c.l.b16 %v820_v3  ;;  %786 = vst [vmem:[#allocation2 + $0x34] sm:$0x1] %v785_v59  ;;  %v580_v47 = vmul.f32 %v3062_v63, %v567_v0  ;;  %v1632_v52 = vunpack.c.l.b16 %v3229_v8  ;;  %v3247_v0 = vpack.c.b16 %v840_v48, %v839_v23 }
 0x10c   : > { %v718_v19 = vshrl.u32 %v667_v62, 16  ;;  %v1089_v55 = vunpack.c.l.b16 %v1052_v16  ;;  %v3233_v21 = vld [vmem:[#allocation2 + $0x2c] sm:$0x1]  ;;  %v1131_v49 = vor.u32 %v1130_v12, %v1126_v10  ;;  %v1188_v34 = vunpack.c.l.b16 %v1060_v4  ;;  %v787_v46 = vld [vmem:[#allocation2 + $0x38] sm:$0xf] }
 0x10d   : > { %v3853_v28 = vunpack.c.l.b16 %v3233_v21  ;;  %v721_v36 = vshll.u32 %v667_v62, 16  ;;  %v592_v44 = vadd.f32 %v3070_v5, %v580_v47  ;;  %v790_v50 = vld [vmem:[#allocation2 + $0x3c] sm:$0x1]  ;;  %v3854_v3 = vunpack.c.l.b16 %v3238_v43 }
 0x10e   : > { %v720_v35 = vrot.slane %v718_v19, 7  ;;  %v1100_v39 = vpack.c.b16 %v1089_v55, %v1088_v17  ;;  %1166 = vrot.lane.b32.xlu1 %v1131_v49, %s2840_s28  ;;  %v1196_v59 = vpack.c.b16 %v1089_v55, %v1188_v34  ;;  %v1009_v16 = vunpack.c.l.b16 %v963_v31 }
 0x10f   : > { %v956_v63 = vpack.c.b16 %v3853_v28, %v948_v18  ;;  %v600_v40 = vmax.f32 %v592_v44, 0.0 }
 0x110   : > { %v723_v54 = vor.u32 %v721_v36, %v720_v35  ;;  %v724_v56 = vrot.slane %v720_v35, 4  ;;  %v1135_v62 = vshll.u32 %v1100_v39, 16  ;;  %v1133_v47 = vshrl.u32 %v1100_v39, 16 }
 0x111   : > { %v964_v5 = vrot.slane %v956_v63, 1  ;;  %v668_v12 = vpack.c.bf16 %v600_v40, %v600_v40  ;;  %v1061_v17 = vld [vmem:[#allocation2 + $0x30] sm:$0xe]  ;;  %v1204_v35 = vrot.slane %v1196_v59, 1 }
 0x112   : > { %v788_v4 = vsel %vm3086_vm6, %v723_v54, %v787_v46  ;;  %v791_v10 = vsel %vm3019_vm4, %v724_v56, %v790_v50  ;;  %v3254_v18 = vld [vmem:[#allocation2 + $0x30] sm:$0xf]  ;;  %v1137_v55 = vrot.slane %v1135_v62, 1  ;;  %v1053_v48 = vld [vmem:[#allocation2 + $0x34] sm:$0x1]  ;;  %v1189_v23 = vunpack.c.l.b16 %v1061_v17 }
 0x113   : > { %v821_v19 = vld [vmem:[#allocation2 + $0x30] sm:$0xe]  ;;  %789 = vst [vmem:[#allocation2 + $0x38] sm:$0xf] %v788_v4  ;;  %v1011_v32 = vunpack.c.l.b16 %v964_v5  ;;  %v726_v49 = vshrl.u32 %v668_v12, 16  ;;  %v1091_v34 = vunpack.c.l.b16 %v1053_v48  ;;  %v1090_v36 = vunpack.c.l.b16 %v3254_v18 }
 0x114   : > { %792 = vst [vmem:[#allocation2 + $0x3c] sm:$0x1] %v791_v10  ;;  %v3257_v44 = vld [vmem:[#allocation2 + $0x34] sm:$0x1]  ;;  %v729_v46 = vshll.u32 %v668_v12, 16  ;;  %v1138_v31 = vor.u32 %v1137_v55, %v1133_v47  ;;  %v949_v40 = vunpack.c.l.b16 %v821_v19  ;;  %v3264_v12 = vpack.c.b16 %v842_v15, %v841_v51 }
 0x115   : > { %v1440_v50 = vpack.c.b16 %v1011_v32, %v1009_v16  ;;  %v3847_v63 = vunpack.c.l.b16 %v3257_v44  ;;  %v728_v54 = vrot.slane %v726_v49, 7  ;;  %v1197_v56 = vpack.c.b16 %v1091_v34, %v1189_v23  ;;  %v793_v62 = vld [vmem:[#allocation2 + $0x40] sm:$0xf]  ;;  %v796_v5 = vld [vmem:[#allocation2 + $0x44] sm:$0x1] }
 0x116   : > { %v1101_v39 = vpack.c.b16 %v1091_v34, %v1090_v36  ;;  %1168 = vrot.lane.b32.xlu2 %v1138_v31, %s2840_s28  ;;  %v1249_v16 = vunpack.c.l.b16 %v1204_v35  ;;  %v866_v47 = vshll.u32 %v3247_v0, 16  ;;  %v3269_v19 = vpack.c.b16 %v3854_v3, %v1632_v52  ;;  %v3279_v49 = vld [vmem:[#allocation2 + $0x10] sm:$0xf] }
 0x117   : > { %2530 = vmatmul.msk.bf16.gmra.mxu0 %vm967_vm7, %v1440_v50  ;;  %v731_v59 = vor.u32 %v729_v46, %v728_v54  ;;  %v732_v4 = vrot.slane %v728_v54, 4  ;;  %v1205_v10 = vrot.slane %v1197_v56, 1  ;;  %v957_v15 = vpack.c.b16 %v3847_v63, %v949_v40  ;;  %v3281_v34 = vld [vmem:[#allocation2 + $0x10] sm:$0xf]  ;;  %v3284_v46 = vld [vmem:[#allocation2 + $0x18] sm:$0xe] }
 0x118   : > { %v1142_v17 = vshll.u32 %v1101_v39, 16  ;;  %v1140_v52 = vshrl.u32 %v1101_v39, 16  ;;  %v864_v50 = vshrl.u32 %v3247_v0, 16  ;;  %v3290_v39 = vld [vmem:[#allocation2 + $0x20] sm:$0xf] }
 0x119   : > { %v794_v55 = vsel %vm3086_vm6, %v731_v59, %v793_v62  ;;  %v797_v32 = vsel %vm3019_vm4, %v732_v4, %v796_v5  ;;  %v1251_v48 = vunpack.c.l.b16 %v1205_v10  ;;  %v868_v62 = vrot.slane %v866_v47, 1  ;;  %3866 = vst [vmem:[#allocation6_spill] sm:$0xff] %v3290_v39  ;;  %v3292_v4 = vld [vmem:[#allocation2 + $0x24] sm:$0x1] }
 0x11a   : > { %v3275_v23 = vld [vmem:[#allocation2 + $0x38] sm:$0xf]  ;;  %795 = vst [vmem:[#allocation2 + $0x40] sm:$0xf] %v794_v55  ;;  %v1144_v35 = vrot.slane %v1142_v17, 1  ;;  %v965_v17 = vrot.slane %v957_v15, 1  ;;  %v1634_v15 = vunpack.c.l.b16 %v3290_v39 }
 0x11b   : > { %v822_v9 = vld [vmem:[#allocation2 + $0x38] sm:$0xe]  ;;  %v1054_v24 = vld [vmem:[#allocation2 + $0x3c] sm:$0x1]  ;;  %v1092_v36 = vunpack.c.l.b16 %v3275_v23  ;;  %798 = vst [vmem:[#allocation2 + $0x44] sm:$0x1] %v797_v32  ;;  %v1286_v31 = vpack.c.b16 %v1251_v48, %v1249_v16  ;;  %v843_v32 = vunpack.c.l.b16 %v3279_v49  ;;  %v1630_v48 = vunpack.c.l.b16 %v3281_v34 }
 0x11c   : > { %v1062_v51 = vld [vmem:[#allocation2 + $0x38] sm:$0xe]  ;;  %v950_v41 = vunpack.c.l.b16 %v822_v9  ;;  %v1093_v54 = vunpack.c.l.b16 %v1054_v24  ;;  %v3287_v56 = vld [vmem:[#allocation2 + $0x3c] sm:$0x1]  ;;  %v1145_v40 = vor.u32 %v1144_v35, %v1140_v52  ;;  %v873_v16 = vshll.u32 %v3264_v12, 16 }
 0x11d   : > { %v3845_v5 = vunpack.c.l.b16 %v3287_v56  ;;  %v1190_v59 = vunpack.c.l.b16 %v1062_v51  ;;  %2478 = vmatmul.msk.bf16.vlgmr.msra.gmra.mxu3 %vm967_vm7, %v1286_v31  ;;  %v1598_v55 = vld [vmem:[#allocation2 + $0x14] sm:$0x1]  ;;  %v1664_v47 = vshll.u32 %v3269_v19, 16  ;;  %v3302_v9 = vld [vmem:[#allocation2 + $0x28] sm:$0xf]  ;;  %v1735_v52 = vunpack.c.l.b16 %v3284_v46 }
 0x11e   : > { %v1102_v10 = vpack.c.b16 %v1093_v54, %v1092_v36  ;;  %1170 = vrot.lane.b32.xlu2 %v1145_v40, %s2840_s28  ;;  %3867 = vst [vmem:[#allocation7_spill] sm:$0xff] %v3302_v9  ;;  %v3307_v24 = vld [vmem:[#allocation2 + $0x2c] sm:$0x1]  ;;  %v869_v36 = vor.u32 %v868_v62, %v864_v50  ;;  %v1606_v40 = vld [vmem:[#allocation2 + $0x10] sm:$0xe]  ;;  %v1013_v25 = vunpack.c.l.b16 %v965_v17  ;;  %v1636_v13 = vunpack.c.l.b16 %v3302_v9 }
 0x11f   : > { %v958_v0 = vpack.c.b16 %v3845_v5, %v950_v41  ;;  %v1198_v41 = vpack.c.b16 %v1093_v54, %v1190_v59  ;;  %v1631_v5 = vunpack.c.l.b16 %v1598_v55  ;;  %v1056_v46 = vld [vmem:[#allocation2 + $0x8] sm:$0xe]  ;;  %v857_v59 = vpack.c.b16 %v844_v1, %v843_v32 }
 0x120   : > { %v1149_v51 = vshll.u32 %v1102_v10, 16  ;;  %v1147_v30 = vshrl.u32 %v1102_v10, 16  ;;  %v3868_v10 = vunpack.c.l.b16 %v3292_v4  ;;  %v3322_v39 = vld [vmem:[#allocation2 + $0x28] sm:$0xf]  ;;  %v875_v61 = vrot.slane %v873_v16, 1 }
 0x121   : > { %v966_v31 = vrot.slane %v958_v0, 1  ;;  %v1063_v37 = vld [vmem:[#allocation2 + $0x40] sm:$0xe]  ;;  %v1206_v0 = vrot.slane %v1198_v41, 1  ;;  %3869 = vst [vmem:[#allocation8_spill] sm:$0xff] %v3322_v39  ;;  %v1666_v1 = vrot.slane %v1664_v47, 1 }
 0x122   : > { %v1151_v63 = vrot.slane %v1149_v51, 1  ;;  %v3309_v60 = vld [vmem:[#allocation2 + $0x40] sm:$0xf]  ;;  %v1055_v28 = vld [vmem:[#allocation2 + $0x44] sm:$0x1]  ;;  %v1191_v3 = vunpack.c.l.b16 %v1063_v37  ;;  %v3318_v17 = vpack.c.b16 %v3868_v10, %v1634_v15  ;;  %v3320_v51 = vpack.c.b16 %v1631_v5, %v1630_v48 }
 0x123   : > { %v1015_v42 = vunpack.c.l.b16 %v966_v31  ;;  %v1094_v35 = vunpack.c.l.b16 %v3309_v60  ;;  %v1095_v54 = vunpack.c.l.b16 %v1055_v28  ;;  %v1734_v31 = vunpack.c.l.b16 %v1606_v40  ;;  %v3332_v48 = vld [vmem:[#allocation2 + $0x18] sm:$0xf] }
 0x124   : > { %v1152_v62 = vor.u32 %v1151_v63, %v1147_v30  ;;  %v1184_v37 = vunpack.c.l.b16 %v1056_v46  ;;  %v871_v30 = vshrl.u32 %v3264_v12, 16  ;;  %v3871_v63 = vunpack.c.l.b16 %v3307_v24 }
 0x125   : > { %v1442_v55 = vpack.c.b16 %v1015_v42, %v1013_v25  ;;  %v1199_v50 = vpack.c.b16 %v1095_v54, %v1191_v3  ;;  %v1103_v28 = vpack.c.b16 %v1095_v54, %v1094_v35  ;;  %v3870_v42 = vunpack.c.l.b16 %v3238_v43 }
 0x126   : > { %1172 = vrot.lane.b32.xlu0 %v1152_v62, %s2840_s28  ;;  %919 = vrot.lane.b32.xlu2 %v869_v36, %s2840_s28  ;;  %v1649_v32 = vpack.c.b16 %v3871_v63, %v1636_v13  ;;  %v880_v3 = vshll.u32 %v857_v59, 16  ;;  %v849_v12 = vunpack.c.l.b16 %v3322_v39  ;;  %v1253_v35 = vunpack.c.l.b16 %v1206_v0 }
 0x127   : > { %2531 = vmatmul.msk.bf16.gmra.mxu0 %vm967_vm7, %v1442_v55  ;;  %v1743_v25 = vpack.c.b16 %v3870_v42, %v1735_v52  ;;  %v1207_v15 = vrot.slane %v1199_v50, 1  ;;  %v1156_v41 = vshll.u32 %v1103_v28, 16  ;;  %v1671_v36 = vshll.u32 %v3318_v17, 16 }
 0x128   : > { %v1657_v40 = vshll.u32 %v3320_v51, 16  ;;  %v1742_v16 = vpack.c.b16 %v1631_v5, %v1734_v31  ;;  %v1154_v46 = vshrl.u32 %v1103_v28, 16  ;;  %v845_v52 = vunpack.c.l.b16 %v3332_v48  ;;  %v3343_v5 = vld [vmem:[#allocation2 + $0x30] sm:$0xf] }
 0x129   : > { %v1255_v47 = vunpack.c.l.b16 %v1207_v15  ;;  %v1158_v43 = vrot.slane %v1156_v41, 1  ;;  %v876_v62 = vor.u32 %v875_v61, %v871_v30  ;;  %v1662_v13 = vshrl.u32 %v3269_v19, 16  ;;  %v1057_v31 = vld [vmem:[#allocation2 + $0x10] sm:$0xe]  ;;  %v3351_v15 = vld [vmem:[#allocation2 + $0x34] sm:$0x1] }
 0x12a   : > { %v1751_v54 = vrot.slane %v1743_v25, 1  ;;  %v1678_v50 = vshll.u32 %v1649_v32, 16  ;;  %v882_v42 = vrot.slane %v880_v3, 1  ;;  %v3872_v0 = vunpack.c.l.b16 %v3233_v21 }
 0x12b   : > { %v1288_v10 = vpack.c.b16 %v1255_v47, %v1253_v35  ;;  %v1159_v55 = vor.u32 %v1158_v43, %v1154_v46  ;;  %v1667_v39 = vor.u32 %v1666_v1, %v1662_v13  ;;  %v878_v9 = vshrl.u32 %v857_v59, 16  ;;  %v1058_v47 = vld [vmem:[#allocation2 + $0x18] sm:$0xe] }
 0x12c   : > { %v3341_v63 = vpack.c.b16 %v3872_v0, %v849_v12  ;;  %v1673_v30 = vrot.slane %v1671_v36, 1  ;;  %v1659_v19 = vrot.slane %v1657_v40, 1  ;;  %v1750_v28 = vrot.slane %v1742_v16, 1 }
 0x12d   : > { %2479 = vmatmul.msk.bf16.gmra.mxu3 %vm967_vm7, %v1288_v10  ;;  %v3873_v61 = vunpack.c.l.b16 %v3186_v38  ;;  %v3874_v21 = vunpack.c.l.b16 %v3109_v7  ;;  %v3355_v59 = vunpack.c.l.b16 %v1751_v54  ;;  %1174 = vrot.lane.b32.xlu1 %v1159_v55, %s2840_s28  ;;  %v1680_v41 = vrot.slane %v1678_v50, 1  ;;  %v1608_v50 = vld [vmem:[#allocation2 + $0x20] sm:$0xe] }
 0x12e   : > { %921 = vrot.lane.b32.xlu0 %v876_v62, %s2840_s28  ;;  %1712 = vrot.lane.b32.xlu2 %v1667_v39, %s2840_s28  ;;  %v883_v3 = vor.u32 %v882_v42, %v878_v9  ;;  %v1669_v12 = vshrl.u32 %v3318_v17, 16  ;;  %v1655_v35 = vshrl.u32 %v3320_v51, 16  ;;  %v901_v38 = vshll.u32 %v3341_v63, 16  ;;  %v3369_v17 = vld [vmem:[#allocation2 + $0x20] sm:$0xf] }
 0x12f   : > { %v3349_v25 = vpack.c.b16 %v3873_v61, %v845_v52  ;;  %v1192_v1 = vpack.c.b16 %v3874_v21, %v1184_v37  ;;  %v1676_v36 = vshrl.u32 %v1649_v32, 16  ;;  %v1638_v40 = vunpack.c.l.b16 %v3343_v5  ;;  %v3364_v37 = vld [vmem:[#allocation2 + $0x30] sm:$0xf]  ;;  %v1059_v51 = vld [vmem:[#allocation2 + $0x20] sm:$0xe] }
 0x130   : > { %v1639_v7 = vunpack.c.l.b16 %v3351_v15  ;;  %v1185_v16 = vunpack.c.l.b16 %v1057_v31  ;;  %v1674_v39 = vor.u32 %v1673_v30, %v1669_v12  ;;  %v1660_v46 = vor.u32 %v1659_v19, %v1655_v35  ;;  %v1609_v31 = vld [vmem:[#allocation2 + $0x28] sm:$0xe]  ;;  %v1610_v15 = vld [vmem:[#allocation2 + $0x30] sm:$0xe] }
 0x131   : > { %v3366_v43 = vunpack.c.l.b16 %v1750_v28  ;;  %v887_v9 = vshll.u32 %v3349_v25, 16  ;;  %v1681_v52 = vor.u32 %v1680_v41, %v1676_v36  ;;  %v899_v32 = vshrl.u32 %v3341_v63, 16  ;;  %v2689_v41 = vld [vmem:[%s3838_s4 + $0x98] sm:$0xff] }
 0x132   : > { %v3875_v62 = vunpack.c.l.b16 %v3138_v53  ;;  %v1200_v54 = vrot.slane %v1192_v1, 1  ;;  %v903_v10 = vrot.slane %v901_v38, 1  ;;  %v885_v55 = vshrl.u32 %v3349_v25, 16  ;;  %1377 = vmatpush.bf16.msra.mxu2 %v2689_v41 }
 0x133   : > { %v851_v42 = vunpack.c.l.b16 %v3364_v37  ;;  %v1186_v0 = vunpack.c.l.b16 %v1058_v47  ;;  %v3376_v30 = vpack.c.b16 %v1639_v7, %v1638_v40  ;;  %v847_v19 = vunpack.c.l.b16 %v3369_v17 }
 0x134   : > { %v1193_v13 = vpack.c.b16 %v3875_v62, %v1185_v16  ;;  %v1187_v61 = vunpack.c.l.b16 %v1059_v51  ;;  %v889_v53 = vrot.slane %v887_v9, 1  ;;  %v3876_v63 = vunpack.c.l.b16 %v3181_v33  ;;  %v3397_v16 = vld [vmem:[#allocation2 + $0x38] sm:$0xf] }
 0x135   : > { %v1832_v25 = vpack.c.b16 %v3355_v59, %v3366_v43  ;;  %v1736_v1 = vunpack.c.l.b16 %v1608_v50  ;;  %1710 = vrot.lane.b32.xlu1 %v1660_v46, %s2840_s28  ;;  %v3389_v12 = vunpack.c.l.b16 %v1200_v54  ;;  %v1737_v38 = vunpack.c.l.b16 %v1609_v31  ;;  %v1603_v54 = vld [vmem:[#allocation2 + $0x3c] sm:$0x1]  ;;  %v2634_v43 = vld [vmem:[%s3841_s7 + $0x30] sm:$0xf] }
 0x136   : > { %v1201_v28 = vrot.slane %v1193_v13, 1  ;;  %923 = vrot.lane.b32.xlu0 %v883_v3, %s2840_s28  ;;  %v1194_v21 = vpack.c.b16 %v3876_v63, %v1186_v0  ;;  %1714 = vrot.lane.b32.xlu2 %v1674_v39, %s2840_s28  ;;  %v3877_v3 = vunpack.c.l.b16 %v3203_v20  ;;  %v3878_v36 = vunpack.c.l.b16 %v3257_v44  ;;  %v3403_v13 = vld [vmem:[#allocation2 + $0x38] sm:$0xf]  ;;  %v2688_v20 = vld [vmem:[%s3838_s4 + $0x90] sm:$0xff] }
 0x137   : > { %v3879_v39 = vunpack.c.l.b16 %v3292_v4  ;;  %v1738_v9 = vunpack.c.l.b16 %v1610_v15  ;;  %v3880_v51 = vunpack.c.l.b16 %v3208_v26  ;;  %v904_v0 = vor.u32 %v903_v10, %v899_v32  ;;  %1378 = vmatpush.bf16.msra.mxu2 %v2688_v20 }
 0x138   : > { %v3391_v35 = vunpack.c.l.b16 %v1201_v28  ;;  %v1195_v33 = vpack.c.b16 %v3877_v3, %v1187_v61  ;;  %v861_v40 = vpack.c.b16 %v3878_v36, %v851_v42  ;;  %v1202_v47 = vrot.slane %v1194_v21, 1 }
 0x139   : > { %v1744_v46 = vpack.c.b16 %v3879_v39, %v1736_v1  ;;  %v859_v62 = vpack.c.b16 %v3880_v51, %v847_v19  ;;  %v3881_v42 = vunpack.c.l.b16 %v3307_v24  ;;  %v890_v31 = vor.u32 %v889_v53, %v885_v55  ;;  %v2687_v24 = vld [vmem:[%s3838_s4 + $0x88] sm:$0xff]  ;;  %v1611_v53 = vld [vmem:[#allocation2 + $0x38] sm:$0xe] }
 0x13a   : > { %v1282_v44 = vpack.c.b16 %v3391_v35, %v3389_v12  ;;  %v1203_v50 = vrot.slane %v1195_v33, 1  ;;  %v1685_v26 = vshll.u32 %v3376_v30, 16  ;;  %v853_v28 = vunpack.c.l.b16 %v3397_v16 }
 0x13b   : > { %v1745_v4 = vpack.c.b16 %v3881_v42, %v1737_v38  ;;  %v1752_v19 = vrot.slane %v1744_v46, 1  ;;  %v3414_v61 = vunpack.c.l.b16 %v1202_v47  ;;  %v908_v21 = vshll.u32 %v861_v40, 16  ;;  %v1604_v46 = vld [vmem:[#allocation2 + $0x44] sm:$0x1]  ;;  %1379 = vmatpush.bf16.msra.mxu2 %v2687_v24  ;;  %v2685_v24 = vld [vmem:[%s3838_s4 + $0x78] sm:$0xff] }
 0x13c   : > { %v3416_v15 = vunpack.c.l.b16 %v1203_v50  ;;  %v1640_v1 = vunpack.c.l.b16 %v3403_v13  ;;  %v1641_v41 = vunpack.c.l.b16 %v1603_v54  ;;  %v1746_v3 = vpack.c.b16 %v1639_v7, %v1738_v9  ;;  %v2686_v42 = vld [vmem:[%s3838_s4 + $0x80] sm:$0xff] }
 0x13d   : > { %v1753_v63 = vrot.slane %v1745_v4, 1  ;;  %v894_v33 = vshll.u32 %v859_v62, 16  ;;  %v3424_v10 = vunpack.c.l.b16 %v1752_v19  ;;  %v1739_v38 = vunpack.c.l.b16 %v1611_v53  ;;  %925 = vrot.lane.b32.xlu1 %v890_v31, %s2840_s28  ;;  %v1605_v4 = vld [vmem:[#allocation2 + $0x4c] sm:$0x1] }
 0x13e   : > { %v1284_v32 = vpack.c.b16 %v3416_v15, %v3414_v61  ;;  %1716 = vrot.lane.b32.xlu0 %v1681_v52, %s2840_s28  ;;  %929 = vrot.lane.b32.xlu2 %v904_v0, %s2840_s28  ;;  %v1687_v7 = vrot.slane %v1685_v26, 1  ;;  %v3882_v47 = vunpack.c.l.b16 %v3287_v56  ;;  %v1754_v51 = vrot.slane %v1746_v3, 1  ;;  %v3439_v0 = vld [vmem:[#allocation2 + $0x40] sm:$0xf] }
 0x13f   : > { %v3426_v55 = vunpack.c.l.b16 %v1753_v63  ;;  %v1747_v9 = vpack.c.b16 %v1641_v41, %v1739_v38  ;;  %v1683_v54 = vshrl.u32 %v3376_v30, 16  ;;  %v910_v20 = vrot.slane %v908_v21, 1  ;;  %1380 = vmatpush.bf16.msra.mxu2 %v2686_v42  ;;  %v1612_v38 = vld [vmem:[#allocation2 + $0x40] sm:$0xe] }
 0x140   : > { %v862_v39 = vpack.c.b16 %v3882_v47, %v853_v28  ;;  %v896_v50 = vrot.slane %v894_v33, 1  ;;  %v1651_v52 = vpack.c.b16 %v1641_v41, %v1640_v1  ;;  %v906_v56 = vshrl.u32 %v861_v40, 16  ;;  %v1613_v40 = vld [vmem:[#allocation2 + $0x48] sm:$0xe] }
 0x141   : > { %v1834_v36 = vpack.c.b16 %v3426_v55, %v3424_v10  ;;  %v1755_v31 = vrot.slane %v1747_v9, 1  ;;  %v1688_v26 = vor.u32 %v1687_v7, %v1683_v54  ;;  %v892_v19 = vshrl.u32 %v859_v62, 16 }
 0x142   : > { %v1643_v28 = vunpack.c.l.b16 %v1604_v46  ;;  %v915_v63 = vshll.u32 %v862_v39, 16  ;;  %v1645_v3 = vunpack.c.l.b16 %v1605_v4  ;;  %v3441_v53 = vunpack.c.l.b16 %v1754_v51 }
 0x143   : > { %v3443_v30 = vunpack.c.l.b16 %v1755_v31  ;;  %v911_v21 = vor.u32 %v910_v20, %v906_v56  ;;  %v897_v1 = vor.u32 %v896_v50, %v892_v19  ;;  %v1692_v41 = vshll.u32 %v1651_v52, 16  ;;  %1381 = vmatpush.bf16.msra.mxu2 %v2685_v24  ;;  %v3457_v56 = vld [vmem:[#allocation2 + $0x48] sm:$0xf] }
 0x144   : > { %v1642_v33 = vunpack.c.l.b16 %v3439_v0  ;;  %v1740_v7 = vunpack.c.l.b16 %v1612_v38  ;;  %v1741_v47 = vunpack.c.l.b16 %v1613_v40  ;;  %v917_v46 = vrot.slane %v915_v63, 1 }
 0x145   : > { %v1836_v62 = vpack.c.b16 %v3443_v30, %v3441_v53  ;;  %927 = vrot.lane.b32.xlu1 %v897_v1, %s2840_s28  ;;  %v1694_v54 = vrot.slane %v1692_v41, 1  ;;  %v913_v50 = vshrl.u32 %v862_v39, 16  ;;  %v1690_v31 = vshrl.u32 %v1651_v52, 16  ;;  %v2683_v39 = vld [vmem:[%s3838_s4 + $0x68] sm:$0xff]  ;;  %v2636_v53 = vld [vmem:[%s3841_s7 + $0x38] sm:$0xf0] }
 0x146   : > { %1718 = vrot.lane.b32.xlu0 %v1688_v26, %s2840_s28  ;;  %931 = vrot.lane.b32.xlu2 %v911_v21, %s2840_s28  ;;  %v1748_v9 = vpack.c.b16 %v1643_v28, %v1740_v7  ;;  %v1749_v51 = vpack.c.b16 %v1645_v3, %v1741_v47  ;;  %v1652_v20 = vpack.c.b16 %v1643_v28, %v1642_v33  ;;  %v2684_v26 = vld [vmem:[%s3838_s4 + $0x70] sm:$0xff]  ;;  %v1644_v21 = vunpack.c.l.b16 %v3457_v56 }
 0x147   : > { %v918_v19 = vor.u32 %v917_v46, %v913_v50  ;;  %v1695_v41 = vor.u32 %v1694_v54, %v1690_v31  ;;  %1382 = vmatpush.bf16.msra.mxu2 %v2684_v26  ;;  %v2682_v46 = vld [vmem:[%s3838_s4 + $0x60] sm:$0xff] }
 0x148   : > { %v1756_v42 = vrot.slane %v1748_v9, 1  ;;  %v1757_v4 = vrot.slane %v1749_v51, 1  ;;  %v1699_v28 = vshll.u32 %v1652_v20, 16  ;;  %v1653_v52 = vpack.c.b16 %v1645_v3, %v1644_v21  ;;  %v2677_v3 = vld [vmem:[%s3838_s4 + $0x38] sm:$0xff]  ;;  %v2674_v26 = vld [vmem:[%s3838_s4 + $0x20] sm:$0xff] }
 0x149   : > { %v1697_v47 = vshrl.u32 %v1652_v20, 16  ;;  %1531 = vmatpush.bf16.msrb.mxu3 %v2677_v3  ;;  %v2676_v20 = vld [vmem:[%s3838_s4 + $0x30] sm:$0xff]  ;;  %v2670_v3 = vld [vmem:[%s3838_s4] sm:$0xff] }
 0x14a   : > { %v3460_v1 = vunpack.c.l.b16 %v1756_v42  ;;  %v3462_v63 = vunpack.c.l.b16 %v1757_v4  ;;  %v1704_v24 = vshrl.u32 %v1653_v52, 16  ;;  %v1706_v38 = vshll.u32 %v1653_v52, 16  ;;  %v2698_v52 = vld [vmem:[%s3838_s4 + $0xe0] sm:$0xff] }
 0x14b   : > { %v1701_v40 = vrot.slane %v1699_v28, 1  ;;  %1383 = vmatpush.bf16.msra.mxu2 %v2683_v39  ;;  %v2672_v39 = vld [vmem:[%s3838_s4 + $0x10] sm:$0xff] }
 0x14c   : > { %v1838_v33 = vpack.c.b16 %v3462_v63, %v3460_v1  ;;  %v1708_v7 = vrot.slane %v1706_v38, 1  ;;  %v2697_v38 = vld [vmem:[%s3838_s4 + $0xd8] sm:$0xff] }
 0x14d   : > { %1720 = vrot.lane.b32.xlu1 %v1695_v41, %s2840_s28  ;;  %v1702_v51 = vor.u32 %v1701_v40, %v1697_v47  ;;  %1532 = vmatpush.bf16.msrb.mxu3 %v2676_v20  ;;  %v2673_v41 = vld [vmem:[%s3838_s4 + $0x18] sm:$0xff] }
 0x14e   : > { %933 = vrot.lane.b32.xlu0 %v918_v19, %s2840_s28  ;;  %v1709_v9 = vor.u32 %v1708_v7, %v1704_v24  ;;  %v2700_v19 = vld [vmem:[%s3838_s4 + $0xf0] sm:$0xff]  ;;  %v2671_v24 = vld [vmem:[%s3838_s4 + $0x8] sm:$0xff] }
 0x14f   : > { %1384 = vmatpush.bf16.msra.mxu2 %v2682_v46 }
 0x150   : > { %1724 = vrot.lane.b32.xlu2 %v1709_v9, %s2840_s28 }
 0x153   : > { %1410 = vmatpush.bf16.msrb.mxu2 %v3122_v22  ;;  %v2701_v22 = vld [vmem:[%s3838_s4 + $0xf8] sm:$0xff] }
 0x154   : > { %1927 = vmatpush.bf16.msra.mxu1 %v2701_v22  ;;  %v2694_v22 = vld [vmem:[%s3838_s4 + $0xc0] sm:$0xff] }
 0x155   : > { %1722 = vrot.lane.b32.xlu1 %v1702_v51, %s2840_s28  ;;  %s2267_s28 = scalar_lea.hbm %s3844_s10, %s2714_s18 }
 0x156   : > { %s2270_s17 = sshll.u32 %s2267_s28, 4  ;;  %s2271_s17 = int_to_ptr.hbm [resolvable:$true] %s2270_s17 }
 0x157   : > { %1411 = vmatpush.bf16.msrb.mxu2 %v3144_v57  ;;  %v2675_v57 = vld [vmem:[%s3838_s4 + $0x28] sm:$0xff]  ;;  %s2789_s27 = sshra.s32 %s2271_s17, 4  ;;  %s2790_s27 = int_to_ptr.hbm [resolvable:$true] %s2789_s27 }
 0x158   : > { %1533 = vmatpush.bf16.msrb.mxu3 %v2675_v57  ;;  %1928 = vmatpush.bf16.msra.mxu1 %v2700_v19  ;;  %s2791_s30 = scalar_lea.hbm %s2790_s27, 128  ;;  %p2796_p0 = scmp.lt.s32.totalorder %s2790_s27, %s3844_s10 }
 0x159   : > { %p2792_p11 = scmp.ne.s32.totalorder %s2790_s27, %s2791_s30  ;;  %p2797_p1 = scmp.lt.s32.totalorder %s2795_s20, %s2791_s30 }
 0x15b   : > { %1412 = vmatpush.bf16.msrb.mxu2 %v3162_v11  ;;  %v2774_v11 = vld [vmem:[#allocation2 + $0x8] sm:$0xf]  ;;  %p2793_p12 = pnand %p2792_p11, %p2936_p5  ;;  %p2798_p2 = por %p2797_p1, %p2796_p0 }
 0x15c   : > { %1534 = vmatpush.bf16.msrb.mxu3 %v2674_v26 }
 0x15d   : > { %p2794_p13 = pneg %p2793_p12 }
 0x15f   : > { %1413 = vmatpush.bf16.msrb.mxu2 %v3179_v29  ;;  %p2799_p3 = pnand %p2798_p2, %p2794_p13 }
 0x160   : > { %1535 = vmatpush.bf16.msrb.mxu3 %v2673_v41 }
 0x164   : > { %1536 = vmatpush.bf16.msrb.mxu3 %v2672_v39 }
 0x168   : > { %v1161_v54 = vpop.permute.xlu0 %1160  ;;  %1537 = vmatpush.bf16.msrb.mxu3 %v2671_v24 }
 0x169   : > { %v1210_v29 = vsel %vm967_vm7, %v2774_v11, %v1161_v54  ;;  %v2696_v54 = vld [vmem:[%s3838_s4 + $0xd0] sm:$0xff] }
 0x16a   : > { %v1240_v4 = vunpack.c.l.b16 %v1210_v29 }
 0x16c   : > { %1538 = vmatpush.bf16.msrb.mxu3 %v2670_v3 }
 0x170   : > { %v1163_v50 = vpop.permute.xlu0 %1162  ;;  %v1169_v7 = vpop.permute.xlu2 %1168 }
 0x171   : > { %v1213_v42 = vsel %vm967_vm7, %v3136_v45, %v1163_v50  ;;  %v2699_v45 = vld [vmem:[%s3838_s4 + $0xe8] sm:$0xff]  ;;  %v1222_v11 = vsel %vm967_vm7, %v3225_v2, %v1169_v7 }
 0x172   : > { %v1242_v31 = vunpack.c.l.b16 %v1213_v42  ;;  %1929 = vmatpush.bf16.msra.mxu1 %v2699_v45  ;;  %v1248_v50 = vunpack.c.l.b16 %v1222_v11 }
 0x174   : > { %v1281_v21 = vpack.c.b16 %v1242_v31, %v1240_v4  ;;  %v2705_v4 = vld [vmem:[%s3838_s4 + $0x118] sm:$0xff] }
 0x176   : > { %1385 = vmatmul.bf16.vlgmr.msra.gmra.mxu2 %v1281_v21  ;;  %1930 = vmatpush.bf16.msra.mxu1 %v2698_v52 }
 0x177   : > { %1960 = vmatpush.bf16.msra.mxu2 %v2705_v4 }
 0x178   : > { %v1165_v28 = vpop.permute.xlu1 %1164 }
 0x179   : > { %v1216_v40 = vsel %vm967_vm7, %v3174_v27, %v1165_v28  ;;  %v2695_v27 = vld [vmem:[%s3838_s4 + $0xc8] sm:$0xff] }
 0x17a   : > { %1931 = vmatpush.bf16.msra.mxu1 %v2697_v38  ;;  %v1244_v9 = vunpack.c.l.b16 %v1216_v40 }
 0x17e   : > { %1932 = vmatpush.bf16.msra.mxu1 %v2696_v54  ;;  %v2702_v54 = vld [vmem:[%s3838_s4 + $0x100] sm:$0xff] }
 0x180   : > { %v1167_v47 = vpop.permute.xlu1 %1166 }
 0x181   : > { %v1219_v46 = vsel %vm967_vm7, %v3201_v14, %v1167_v47  ;;  %v1171_v14 = vpop.permute.xlu2 %1170 }
 0x182   : > { %v1246_v51 = vunpack.c.l.b16 %v1219_v46  ;;  %1933 = vmatpush.bf16.msra.mxu1 %v2695_v27  ;;  %v1225_v57 = vsel %vm967_vm7, %v3254_v18, %v1171_v14  ;;  %v2704_v18 = vld [vmem:[%s3838_s4 + $0x110] sm:$0xff] }
 0x183   : > { %v1250_v29 = vunpack.c.l.b16 %v1225_v57  ;;  %1961 = vmatpush.bf16.msra.mxu2 %v2704_v18 }
 0x184   : > { %v1283_v20 = vpack.c.b16 %v1246_v51, %v1244_v9 }
 0x185   : > { %v1285_v42 = vpack.c.b16 %v1250_v29, %v1248_v50  ;;  %v3883_v29 = vld [vmem:[#allocation7_spill] sm:$0xff] }
 0x186   : > { %1390 = vmatmul.bf16.gmra.mxu2 %v1283_v20  ;;  %1934 = vmatpush.bf16.msra.mxu1 %v2694_v22 }
 0x189   : > { %v920_v26 = vpop.permute.xlu2 %919 }
 0x18a   : > { %v970_v19 = vsel %vm967_vm7, %v3218_v58, %v920_v26 }
 0x18b   : > { %v1000_v21 = vunpack.c.l.b16 %v970_v19 }
 0x191   : > { %v1713_v40 = vpop.permute.xlu2 %1712 }
 0x196   : > { %1395 = vmatmul.bf16.gmra.mxu2 %v1285_v42 }
 0x198   : > { %v1173_v31 = vpop.permute.xlu0 %1172 }
 0x199   : > { %v1228_v2 = vsel %vm967_vm7, %v3275_v23, %v1173_v31  ;;  %v2703_v23 = vld [vmem:[%s3838_s4 + $0x108] sm:$0xff]  ;;  %v1715_v14 = vpop.permute.xlu2 %1714 }
 0x19a   : > { %v1252_v24 = vunpack.c.l.b16 %v1228_v2  ;;  %1962 = vmatpush.bf16.msra.mxu2 %v2703_v23 }
 0x19e   : > { %1963 = vmatpush.bf16.msra.mxu2 %v2702_v54  ;;  %v2628_v54 = vld [vmem:[%s3841_s7 + $0x28] sm:$0xf0] }
 0x19f   : > { %v1175_v28 = vpop.permute.xlu1 %1174 }
 0x1a0   : > { %v922_v41 = vpop.permute.xlu0 %921  ;;  %v1231_v52 = vsel %vm967_vm7, %v3309_v60, %v1175_v28 }
 0x1a1   : > { %v973_v45 = vsel %vm967_vm7, %v3227_v6, %v922_v41  ;;  %v1254_v58 = vunpack.c.l.b16 %v1231_v52  ;;  %v1763_v6 = vsel %vm967_vm7, %v3229_v8, %v1713_v40  ;;  %v930_v26 = vpop.permute.xlu2 %929 }
 0x1a2   : > { %v1002_v39 = vunpack.c.l.b16 %v973_v45  ;;  %v1792_v9 = vunpack.c.l.b16 %v1763_v6 }
 0x1a3   : > { %v1287_v7 = vpack.c.b16 %v1254_v58, %v1252_v24 }
 0x1a4   : > { %v1435_v38 = vpack.c.b16 %v1002_v39, %v1000_v21  ;;  %v3885_v21 = vld [vmem:[#allocation8_spill] sm:$0xff] }
 0x1a5   : > { %v985_v2 = vsel %vm967_vm7, %v3885_v21, %v930_v26  ;;  %v2707_v26 = vld [vmem:[%s3841_s7 + $0x4] sm:$0xf0] }
 0x1a6   : > { %1539 = vmatmul.bf16.vlgmr.msrb.gmra.mxu3 %v1435_v38  ;;  %1400 = vmatmul.bf16.gmra.mxu2 %v1287_v7  ;;  %v1010_v35 = vunpack.c.l.b16 %v985_v2  ;;  %v1569_v2 = vpop.f32.mrf.mxu0 }
 0x1a7   : > { %v1711_v46 = vpop.permute.xlu1 %1710 }
 0x1a8   : > { %v924_v47 = vpop.permute.xlu0 %923  ;;  %v1760_v60 = vsel %vm967_vm7, %v3281_v34, %v1711_v46  ;;  %v2711_v46 = vld [vmem:[%s3841_s7 + $0x24] sm:$0xf0] }
 0x1a9   : > { %v1790_v51 = vunpack.c.l.b16 %v1760_v60  ;;  %v976_v20 = vsel %vm967_vm7, %v3279_v49, %v924_v47  ;;  %v3884_v49 = vld [vmem:[#allocation6_spill] sm:$0xff]  ;;  %v932_v52 = vpop.permute.xlu2 %931 }
 0x1aa   : > { %v1004_v22 = vunpack.c.l.b16 %v976_v20  ;;  %v1766_v42 = vsel %vm967_vm7, %v3884_v49, %v1715_v14 }
 0x1ab   : > { %v1831_v3 = vpack.c.b16 %v1792_v9, %v1790_v51 }
 0x1ad   : > { %1935 = vmatmul.bf16.vlgmr.msra.gmra.mxu1 %v1831_v3  ;;  %v2710_v3 = vld [vmem:[%s3841_s7 + $0x24] sm:$0xf] }
 0x1ae   : > { %v2631_v20 = vor.u32 %v2710_v3, %v2628_v54 }
 0x1af   : > { %v926_v27 = vpop.permute.xlu1 %925 }
 0x1b0   : > { %v979_v8 = vsel %vm967_vm7, %v3332_v48, %v926_v27  ;;  %v1717_v57 = vpop.permute.xlu0 %1716  ;;  %v1794_v48 = vunpack.c.l.b16 %v1766_v42 }
 0x1b1   : > { %v1006_v34 = vunpack.c.l.b16 %v979_v8  ;;  %v1769_v50 = vsel %vm967_vm7, %v3883_v29, %v1717_v57  ;;  %v1725_v15 = vpop.permute.xlu2 %1724  ;;  %v2709_v57 = vld [vmem:[%s3841_s7 + $0x14] sm:$0xf0]  ;;  %v2708_v29 = vld [vmem:[%s3841_s7 + $0x14] sm:$0xf] }
 0x1b2   : > { %v1796_v4 = vunpack.c.l.b16 %v1769_v50  ;;  %v2620_v50 = vld [vmem:[%s3841_s7 + $0x18] sm:$0xf0] }
 0x1b3   : > { %v1437_v11 = vpack.c.b16 %v1006_v34, %v1004_v22  ;;  %v2618_v22 = vld [vmem:[%s3841_s7 + $0x10] sm:$0xf]  ;;  %v2623_v49 = vor.u32 %v2708_v29, %v2620_v50 }
 0x1b4   : > { %v1833_v19 = vpack.c.b16 %v1796_v4, %v1794_v48  ;;  %v2619_v34 = vor.u32 %v2709_v57, %v2618_v22  ;;  %v2610_v48 = vld [vmem:[%s3841_s7] sm:$0xf] }
 0x1b6   : > { %2476 = vmatmul.msk.bf16.vlgmr.msrb.gmra.mxu2 %vm967_vm7, %v1282_v44  ;;  %1544 = vmatmul.bf16.gmra.mxu3 %v1437_v11 }
 0x1b7   : > { %v928_v31 = vpop.permute.xlu1 %927 }
 0x1b8   : > { %v982_v18 = vsel %vm967_vm7, %v3369_v17, %v928_v31  ;;  %v1719_v41 = vpop.permute.xlu0 %1718 }
 0x1b9   : > { %v1008_v12 = vunpack.c.l.b16 %v982_v18  ;;  %v1772_v17 = vsel %vm967_vm7, %v3343_v5, %v1719_v41  ;;  %v1781_v5 = vsel %vm967_vm7, %v3457_v56, %v1725_v15 }
 0x1ba   : > { %v1798_v24 = vunpack.c.l.b16 %v1772_v17  ;;  %v1571_v17 = vpop.f32.mrf.mxu0 }
 0x1bb   : > { %v1439_v45 = vpack.c.b16 %v1010_v35, %v1008_v12  ;;  %v2706_v12 = vld [vmem:[%s3841_s7 + $0x4] sm:$0xf]  ;;  %v2612_v35 = vld [vmem:[%s3841_s7 + $0x8] sm:$0xf0] }
 0x1bd   : > { %1940 = vmatmul.bf16.gmra.mxu1 %v1833_v19  ;;  %v2611_v19 = vor.u32 %v2707_v26, %v2610_v48 }
 0x1bf   : > { %v1721_v44 = vpop.permute.xlu1 %1720 }
 0x1c0   : > { %v1775_v28 = vsel %vm967_vm7, %v3403_v13, %v1721_v44  ;;  %v934_v58 = vpop.permute.xlu0 %933  ;;  %v988_v13 = vsel %vm967_vm7, %v3364_v37, %v932_v52  ;;  %v2615_v44 = vor.u32 %v2706_v12, %v2612_v35 }
 0x1c1   : > { %v1800_v39 = vunpack.c.l.b16 %v1775_v28  ;;  %v991_v40 = vsel %vm967_vm7, %v3397_v16, %v934_v58  ;;  %v1012_v61 = vunpack.c.l.b16 %v988_v13  ;;  %v1804_v16 = vunpack.c.l.b16 %v1781_v5 }
 0x1c2   : > { %v1014_v7 = vunpack.c.l.b16 %v991_v40 }
 0x1c3   : > { %v1835_v38 = vpack.c.b16 %v1800_v39, %v1798_v24 }
 0x1c4   : > { %v1441_v23 = vpack.c.b16 %v1014_v7, %v1012_v61  ;;  %v1574_v61 = vpop.f32.mrf.mxu0 }
 0x1c6   : > { %2477 = vmatmul.msk.bf16.gmra.mxu2 %vm967_vm7, %v1284_v32  ;;  %1549 = vmatmul.bf16.gmra.mxu3 %v1439_v45 }
 0x1c7   : > { %v1723_v32 = vpop.permute.xlu1 %1722 }
 0x1c8   : > { %v1778_v6 = vsel %vm967_vm7, %v3439_v0, %v1723_v32 }
 0x1c9   : > { %v1802_v47 = vunpack.c.l.b16 %v1778_v6 }
 0x1cb   : > { %v1837_v37 = vpack.c.b16 %v1804_v16, %v1802_v47  ;;  %v3684_v47 = vld [vmem:[%s3840_s6] ss:$0 sm:$0xff] }
 0x1cd   : > { %1945 = vmatmul.bf16.gmra.mxu1 %v1835_v38 }
 0x1d6   : > { %1554 = vmatmul.bf16.gmra.mxu3 %v1441_v23  ;;  %2604 = vmatmul.msk.bf16.vlgmr.msra.gmra.mxu2 %vm967_vm7, %v1832_v25  ;;  %v2713_v25 = vld [vmem:[%s3841_s7 + $0x34] sm:$0xf0]  ;;  %v3678_v23 = vld [vmem:[%s3839_s5] ss:$0 sm:$0xff] }
 0x1d7   : > { %v2635_v10 = vor.u32 %v2713_v25, %v2634_v43 }
 0x1d9   : > { %2093 = vmatpush.bf16.msra.mxu3 %v2635_v10 }
 0x1dd   : > { %1950 = vmatmul.bf16.gmra.mxu1 %v1837_v37 }
 0x1e6   : > { %2605 = vmatmul.msk.bf16.gmra.mxu2 %vm967_vm7, %v1834_v36  ;;  %v2712_v36 = vld [vmem:[%s3841_s7 + $0x34] sm:$0xf] }
 0x1e7   : > { %v2639_v30 = vor.u32 %v2712_v36, %v2636_v53  ;;  %v1576_v53 = vpop.f32.mrf.mxu0 }
 0x1e9   : > { %2122 = vmatpush.bf16.msra.mxu0 %v2639_v30 }
 0x1ed   : > { %2123 = vmatpush.bf16.msra.mxu0 %v2631_v20 }
 0x1f1   : > { %2124 = vmatpush.bf16.msra.mxu0 %v2623_v49 }
 0x1f5   : > { %2125 = vmatpush.bf16.msra.mxu0 %v2615_v44 }
 0x1f6   : > { %2606 = vmatmul.msk.bf16.gmra.mxu2 %vm967_vm7, %v1836_v62  ;;  %v1425_v62 = vpop.f32.mrf.mxu3 }
 0x1f9   : > { %v1386_v0 = vpop.f32.mrf.mxu2 }
 0x1fe   : > { %v3635_v9 = vpop.f32.mrf.mxu3 }
 0x201   : > { %v1388_v56 = vpop.f32.mrf.mxu2 }
 0x206   : > { %2607 = vmatmul.msk.bf16.gmra.mxu2 %vm967_vm7, %v1838_v33  ;;  %v2626_v33 = vld [vmem:[%s3841_s7 + $0x20] sm:$0xf]  ;;  %v1430_v27 = vpop.f32.mrf.mxu3 }
 0x207   : > { %v2627_v60 = vor.u32 %v2711_v46, %v2626_v33 }
 0x209   : > { %v3611_v59 = vpop.f32.mrf.mxu2  ;;  %2094 = vmatpush.bf16.msra.mxu3 %v2627_v60 }
 0x20d   : > { %2095 = vmatpush.bf16.msra.mxu3 %v2619_v34  ;;  %v1579_v34 = vpop.f32.mrf.mxu0 }
 0x20e   : > { %v3661_v4 = vpop.f32.mrf.mxu3 }
 0x211   : > { %v3619_v55 = vpop.f32.mrf.mxu2  ;;  %2096 = vmatpush.bf16.msra.mxu3 %v2611_v19 }
 0x215   : > { %v1581_v35 = vpop.f32.mrf.mxu0 }
 0x219   : > { %v1396_v1 = vpop.f32.mrf.mxu2 }
 0x21a   : > { %v3627_v63 = vadd.f32 %v1425_v62, %v1396_v1 }
 0x221   : > { %v3637_v51 = vpop.f32.mrf.mxu2 }
 0x222   : > { %v1428_v44 = vadd.f32 %v3635_v9, %v3637_v51 }
 0x229   : > { %v1401_v8 = vpop.f32.mrf.mxu2  ;;  %v1540_v18 = vpop.f32.mrf.mxu3 }
 0x22a   : > { %v3645_v14 = vadd.f32 %v1430_v27, %v1401_v8  ;;  %v1936_v41 = vpop.f32.mrf.mxu1 }
 0x231   : > { %v3653_v11 = vpop.f32.mrf.mxu2  ;;  %v1542_v45 = vpop.f32.mrf.mxu3 }
 0x232   : > { %v1938_v52 = vpop.f32.mrf.mxu1 }
 0x239   : > { %v1415_v42 = vpop.f32.mrf.mxu2  ;;  %v1545_v58 = vpop.f32.mrf.mxu3 }
 0x23a   : > { %v1416_v39 = vadd.f32 %v1415_v42, %v1386_v0  ;;  %v1941_v5 = vpop.f32.mrf.mxu1 }
 0x23c   : > { %v1541_v24 = vadd.f32 %v1540_v18, %v1416_v39 }
 0x23e   : > { %v1570_v7 = vadd.f32 %v1569_v2, %v1541_v24 }
 0x241   : > { %v1417_v31 = vpop.f32.mrf.mxu2 }
 0x242   : > { %v1418_v40 = vadd.f32 %v1417_v31, %v1388_v56  ;;  %v1547_v56 = vpop.f32.mrf.mxu3  ;;  %v1943_v1 = vpop.f32.mrf.mxu1 }
 0x244   : > { %v1543_v15 = vadd.f32 %v1542_v45, %v1418_v40 }
 0x246   : > { %v1572_v37 = vadd.f32 %v1571_v17, %v1543_v15 }
 0x249   : > { %v1420_v21 = vpop.f32.mrf.mxu2 }
 0x24a   : > { %v1421_v43 = vadd.f32 %v1420_v21, %v3611_v59  ;;  %v1550_v8 = vpop.f32.mrf.mxu3  ;;  %v1946_v42 = vpop.f32.mrf.mxu1 }
 0x24b   : > { %v1551_v19 = vadd.f32 %v1550_v8, %v3627_v63 }
 0x24c   : > { %v1546_v30 = vadd.f32 %v1545_v58, %v1421_v43 }
 0x24d   : > { %v1580_v45 = vadd.f32 %v1579_v34, %v1551_v19 }
 0x24e   : > { %v1575_v27 = vadd.f32 %v1574_v61, %v1546_v30 }
 0x251   : > { %v1422_v28 = vpop.f32.mrf.mxu2 }
 0x252   : > { %v1423_v46 = vadd.f32 %v1422_v28, %v3619_v55  ;;  %v1552_v26 = vpop.f32.mrf.mxu3  ;;  %v1948_v17 = vpop.f32.mrf.mxu1 }
 0x253   : > { %v1553_v39 = vadd.f32 %v1552_v26, %v1428_v44 }
 0x254   : > { %v1548_v59 = vadd.f32 %v1547_v56, %v1423_v46  ;;  %v1433_v56 = vadd.f32 %v3661_v4, %v3653_v11 }
 0x255   : > { %v1582_v58 = vadd.f32 %v1581_v35, %v1553_v39 }
 0x256   : > { %v1577_v50 = vadd.f32 %v1576_v53, %v1548_v59 }
 0x259   : > { %v1965_v38 = vpop.f32.mrf.mxu2 }
 0x25a   : > { %v1966_v13 = vadd.f32 %v1965_v38, %v1936_v41  ;;  %v1555_v63 = vpop.f32.mrf.mxu3  ;;  %v1951_v51 = vpop.f32.mrf.mxu1 }
 0x25b   : > { %v1556_v15 = vadd.f32 %v1555_v63, %v3645_v14 }
 0x25c   : > { %v1985_v32 = vadd.f32 %v1966_v13, %v1570_v7  ;;  %v1584_v7 = vpop.f32.mrf.mxu0 }
 0x25d   : > { %v1585_v43 = vadd.f32 %v1584_v7, %v1556_v15 }
 0x25e   : > { %v1997_v16 = vmul.f32 %v3678_v23, %v1985_v32 }
 0x260   : > { %v2009_v10 = vadd.f32 %v3684_v47, %v1997_v16 }
 0x261   : > { %v1967_v6 = vpop.f32.mrf.mxu2 }
 0x262   : > { %v1968_v0 = vadd.f32 %v1967_v6, %v1938_v52  ;;  %v2017_v60 = vmax.f32 %v2009_v10, 0.0  ;;  %v1953_v14 = vpop.f32.mrf.mxu1 }
 0x264   : > { %v1986_v25 = vadd.f32 %v1968_v0, %v1572_v37  ;;  %v1557_v0 = vpop.f32.mrf.mxu3  ;;  %v1586_v53 = vpop.f32.mrf.mxu0 }
 0x265   : > { %v1558_v10 = vadd.f32 %v1557_v0, %v1433_v56 }
 0x266   : > { %v1998_v36 = vmul.f32 %v3678_v23, %v1986_v25 }
 0x268   : > { %v2010_v62 = vadd.f32 %v3684_v47, %v1998_v36 }
 0x269   : > { %v1970_v33 = vpop.f32.mrf.mxu2 }
 0x26a   : > { %v2018_v3 = vmax.f32 %v2010_v62, 0.0  ;;  %v1971_v54 = vadd.f32 %v1970_v33, %v1941_v5  ;;  %v1587_v62 = vadd.f32 %v1586_v53, %v1558_v10 }
 0x26c   : > { %v2025_v20 = vpack.c.bf16 %v2018_v3, %v2017_v60  ;;  %v1987_v22 = vadd.f32 %v1971_v54, %v1575_v27  ;;  %v2163_v27 = vld [vmem:[%s3842_s8] sm:$0x3] }
 0x26d   : > { %v3723_v8 = vperm.slane %v2163_v27, 1 }
 0x26e   : > { %2640 = vmatmul.msk.bf16.vlgmr.msra.gmra.mxu3 %vm967_vm7, %v2025_v20  ;;  %2644 = vmatmul.msk.bf16.vlgmr.msra.gmra.mxu0 %vm967_vm7, %v2025_v20  ;;  %v1999_v29 = vmul.f32 %v3678_v23, %v1987_v22 }
 0x270   : > { %v2011_v48 = vadd.f32 %v3684_v47, %v1999_v29  ;;  %v3733_v29 = vperm.slane %v2163_v27, 0 }
 0x271   : > { %v1972_v57 = vpop.f32.mrf.mxu2 }
 0x272   : > { %v1973_v49 = vadd.f32 %v1972_v57, %v1943_v1  ;;  %v2019_v41 = vmax.f32 %v2011_v48, 0.0  ;;  %v2148_v57 = vld [vmem:[%s2972_s12 + $0x8] sm:$0xff]  ;;  %v2147_v48 = vld [vmem:[%s2972_s12] sm:$0xff] }
 0x274   : > { %v1988_v55 = vadd.f32 %v1973_v49, %v1577_v50 }
 0x276   : > { %v2000_v31 = vmul.f32 %v3678_v23, %v1988_v55 }
 0x278   : > { %v2012_v18 = vadd.f32 %v3684_v47, %v2000_v31 }
 0x279   : > { %v1975_v21 = vpop.f32.mrf.mxu2 }
 0x27a   : > { %v1976_v2 = vadd.f32 %v1975_v21, %v1946_v42  ;;  %v2020_v12 = vmax.f32 %v2012_v18, 0.0  ;;  %v2150_v21 = vld [vmem:[%s2972_s12 + $0x18] sm:$0xff] }
 0x27c   : > { %v2026_v28 = vpack.c.bf16 %v2020_v12, %v2019_v41  ;;  %v1989_v52 = vadd.f32 %v1976_v2, %v1580_v45 }
 0x27e   : > { %2641 = vmatmul.msk.bf16.gmra.mxu3 %vm967_vm7, %v2026_v28  ;;  %2645 = vmatmul.msk.bf16.gmra.mxu0 %vm967_vm7, %v2026_v28  ;;  %v2001_v38 = vmul.f32 %v3678_v23, %v1989_v52 }
 0x280   : > { %v2013_v9 = vadd.f32 %v3684_v47, %v2001_v38 }
 0x281   : > { %v1977_v24 = vpop.f32.mrf.mxu2 }
 0x282   : > { %v1978_v40 = vadd.f32 %v1977_v24, %v1948_v17  ;;  %v2021_v16 = vmax.f32 %v2013_v9, 0.0  ;;  %v2149_v17 = vld [vmem:[%s2972_s12 + $0x10] sm:$0xff]  ;;  %v2152_v24 = vld [vmem:[%s2972_s12 + $0x28] sm:$0xff] }
 0x284   : > { %v1990_v13 = vadd.f32 %v1978_v40, %v1582_v58 }
 0x286   : > { %v2002_v61 = vmul.f32 %v3678_v23, %v1990_v13 }
 0x288   : > { %v2014_v32 = vadd.f32 %v3684_v47, %v2002_v61 }
 0x289   : > { %v1980_v5 = vpop.f32.mrf.mxu2 }
 0x28a   : > { %v1981_v6 = vadd.f32 %v1980_v5, %v1951_v51  ;;  %v2022_v37 = vmax.f32 %v2014_v32, 0.0  ;;  %v2151_v51 = vld [vmem:[%s2972_s12 + $0x20] sm:$0xff] }
 0x28c   : > { %v2027_v25 = vpack.c.bf16 %v2022_v37, %v2021_v16  ;;  %v1991_v36 = vadd.f32 %v1981_v6, %v1585_v43  ;;  %v2154_v6 = vld [vmem:[%s2972_s12 + $0x38] sm:$0xff] }
 0x28e   : > { %2642 = vmatmul.msk.bf16.gmra.mxu3 %vm967_vm7, %v2027_v25  ;;  %2646 = vmatmul.msk.bf16.gmra.mxu0 %vm967_vm7, %v2027_v25  ;;  %v2003_v1 = vmul.f32 %v3678_v23, %v1991_v36  ;;  %v2153_v36 = vld [vmem:[%s2972_s12 + $0x30] sm:$0xff] }
 0x290   : > { %v2015_v4 = vadd.f32 %v3684_v47, %v2003_v1 }
 0x291   : > { %v1982_v30 = vpop.f32.mrf.mxu2 }
 0x292   : > { %v1983_v33 = vadd.f32 %v1982_v30, %v1953_v14  ;;  %v2023_v3 = vmax.f32 %v2015_v4, 0.0 }
 0x294   : > { %v1992_v46 = vadd.f32 %v1983_v33, %v1587_v62  ;;  %v2156_v62 = vld [vmem:[%s2972_s12 + $0x48] sm:$0xff] }
 0x296   : > { %v2004_v11 = vmul.f32 %v3678_v23, %v1992_v46  ;;  %v2185_v23 = vld [vmem:[%s3843_s9] sm:$0x3] }
 0x297   : > { %v3725_v59 = vperm.slane %v2185_v23, 1  ;;  %v3735_v49 = vperm.slane %v2185_v23, 0 }
 0x298   : > { %v2016_v60 = vadd.f32 %v3684_v47, %v2004_v11 }
 0x29a   : > { %v2024_v54 = vmax.f32 %v2016_v60, 0.0 }
 0x29c   : > { %v2028_v20 = vpack.c.bf16 %v2024_v54, %v2023_v3  ;;  %v2155_v54 = vld [vmem:[%s2972_s12 + $0x40] sm:$0xff] }
 0x29e   : > { %2643 = vmatmul.msk.bf16.gmra.mxu3 %vm967_vm7, %v2028_v20  ;;  %2647 = vmatmul.msk.bf16.gmra.mxu0 %vm967_vm7, %v2028_v20 }
 0x2eb   : > { %v2127_v47 = vpop.f32.mrf.mxu0 }
 0x2ec   : > { %v2170_v22 = vmul.f32 %v3723_v8, %v2127_v47  ;;  %v2158_v47 = vld [vmem:[%s2972_s12 + $0x58] sm:$0xff] }
 0x2ee   : > { %v2192_v34 = vadd.f32 %v3725_v59, %v2170_v22 }
 0x2f0   : > { %v2208_v50 = vadd.f32 %v2192_v34, %v2148_v57 }
 0x2f1   : > { %v2098_v42 = vpop.f32.mrf.mxu3 }
 0x2f2   : > { %v2224_v55 = vmax.f32 %v2208_v50, 0.0  ;;  %v2169_v31 = vmul.f32 %v3733_v29, %v2098_v42 }
 0x2f3   : > { %v2129_v26 = vpop.f32.mrf.mxu0 }
 0x2f4   : > { %2240 = vst [vmem:[%s3739_s11 + $0x8] sm:$0xff] %v2224_v55  ;;  %v2191_v19 = vadd.f32 %v3735_v49, %v2169_v31  ;;  %v2172_v18 = vmul.f32 %v3723_v8, %v2129_v26 }
 0x2f6   : > { %v2207_v2 = vadd.f32 %v2191_v19, %v2147_v48  ;;  %v2194_v41 = vadd.f32 %v3725_v59, %v2172_v18  ;;  %v2157_v48 = vld [vmem:[%s2972_s12 + $0x50] sm:$0xff] }
 0x2f8   : > { %v2223_v12 = vmax.f32 %v2207_v2, 0.0  ;;  %v2210_v35 = vadd.f32 %v2194_v41, %v2150_v21  ;;  %v2160_v21 = vld [vmem:[%s2972_s12 + $0x68] sm:$0xff] }
 0x2f9   : > { %v2100_v44 = vpop.f32.mrf.mxu3 }
 0x2fa   : > { %2239 = vst [vmem:[%s3739_s11] sm:$0xff] %v2223_v12  ;;  %v2226_v45 = vmax.f32 %v2210_v35, 0.0  ;;  %v2171_v28 = vmul.f32 %v3733_v29, %v2100_v44 }
 0x2fb   : > { %v2132_v39 = vpop.f32.mrf.mxu0 }
 0x2fc   : > { %2242 = vst [vmem:[%s3739_s11 + $0x18] sm:$0xff] %v2226_v45  ;;  %v2193_v52 = vadd.f32 %v3735_v49, %v2171_v28  ;;  %v2174_v63 = vmul.f32 %v3723_v8, %v2132_v39 }
 0x2fe   : > { %v2209_v58 = vadd.f32 %v2193_v52, %v2149_v17  ;;  %v2196_v38 = vadd.f32 %v3725_v59, %v2174_v63  ;;  %v2159_v17 = vld [vmem:[%s2972_s12 + $0x60] sm:$0xff] }
 0x300   : > { %v2225_v40 = vmax.f32 %v2209_v58, 0.0  ;;  %v2212_v13 = vadd.f32 %v2196_v38, %v2152_v24  ;;  %v2162_v24 = vld [vmem:[%s2972_s12 + $0x78] sm:$0xff] }
 0x301   : > { %v2103_v7 = vpop.f32.mrf.mxu3 }
 0x302   : > { %2241 = vst [vmem:[%s3739_s11 + $0x10] sm:$0xff] %v2225_v40  ;;  %v2228_v61 = vmax.f32 %v2212_v13, 0.0  ;;  %v2173_v9 = vmul.f32 %v3733_v29, %v2103_v7 }
 0x303   : > { %v2134_v15 = vpop.f32.mrf.mxu0 }
 0x304   : > { %2244 = vst [vmem:[%s3739_s11 + $0x28] sm:$0xff] %v2228_v61  ;;  %v2195_v32 = vadd.f32 %v3735_v49, %v2173_v9  ;;  %v2176_v5 = vmul.f32 %v3723_v8, %v2134_v15 }
 0x306   : > { %v2211_v16 = vadd.f32 %v2195_v32, %v2151_v51  ;;  %v2198_v37 = vadd.f32 %v3725_v59, %v2176_v5 }
 0x308   : > { %v2227_v0 = vmax.f32 %v2211_v16, 0.0  ;;  %v2214_v56 = vadd.f32 %v2198_v37, %v2154_v6 }
 0x309   : > { %v2105_v43 = vpop.f32.mrf.mxu3 }
 0x30a   : > { %2243 = vst [vmem:[%s3739_s11 + $0x20] sm:$0xff] %v2227_v0  ;;  %v2230_v25 = vmax.f32 %v2214_v56, 0.0  ;;  %v2175_v10 = vmul.f32 %v3733_v29, %v2105_v43 }
 0x30b   : > { %v2137_v53 = vpop.f32.mrf.mxu0 }
 0x30c   : > { %2246 = vst [vmem:[%s3739_s11 + $0x38] sm:$0xff] %v2230_v25  ;;  %v2197_v14 = vadd.f32 %v3735_v49, %v2175_v10  ;;  %v2178_v30 = vmul.f32 %v3723_v8, %v2137_v53 }
 0x30e   : > { %v2213_v1 = vadd.f32 %v2197_v14, %v2153_v36  ;;  %v2200_v33 = vadd.f32 %v3725_v59, %v2178_v30 }
 0x310   : > { %v2229_v46 = vmax.f32 %v2213_v1, 0.0  ;;  %v2216_v11 = vadd.f32 %v2200_v33, %v2156_v62 }
 0x311   : > { %v2108_v4 = vpop.f32.mrf.mxu3 }
 0x312   : > { %2245 = vst [vmem:[%s3739_s11 + $0x30] sm:$0xff] %v2229_v46  ;;  %v2232_v60 = vmax.f32 %v2216_v11, 0.0  ;;  %v2177_v3 = vmul.f32 %v3733_v29, %v2108_v4 }
 0x313   : > { %v2139_v20 = vpop.f32.mrf.mxu0 }
 0x314   : > { %2248 = vst [vmem:[%s3739_s11 + $0x48] sm:$0xff] %v2232_v60  ;;  %v2199_v27 = vadd.f32 %v3735_v49, %v2177_v3  ;;  %v2180_v23 = vmul.f32 %v3723_v8, %v2139_v20 }
 0x316   : > { %v2215_v22 = vadd.f32 %v2199_v27, %v2155_v54  ;;  %v2202_v57 = vadd.f32 %v3725_v59, %v2180_v23 }
 0x318   : > { %v2231_v34 = vmax.f32 %v2215_v22, 0.0  ;;  %v2218_v50 = vadd.f32 %v2202_v57, %v2158_v47 }
 0x319   : > { %v2110_v42 = vpop.f32.mrf.mxu3 }
 0x31a   : > { %2247 = vst [vmem:[%s3739_s11 + $0x40] sm:$0xff] %v2231_v34  ;;  %v2234_v55 = vmax.f32 %v2218_v50, 0.0  ;;  %v2179_v31 = vmul.f32 %v3733_v29, %v2110_v42 }
 0x31b   : > { %v2142_v26 = vpop.f32.mrf.mxu0 }
 0x31c   : > { %2250 = vst [vmem:[%s3739_s11 + $0x58] sm:$0xff] %v2234_v55  ;;  %v2201_v19 = vadd.f32 %v3735_v49, %v2179_v31  ;;  %v2182_v18 = vmul.f32 %v3723_v8, %v2142_v26 }
 0x31e   : > { %v2217_v2 = vadd.f32 %v2201_v19, %v2157_v48  ;;  %v2204_v41 = vadd.f32 %v3725_v59, %v2182_v18 }
 0x320   : > { %v2233_v12 = vmax.f32 %v2217_v2, 0.0  ;;  %v2220_v35 = vadd.f32 %v2204_v41, %v2160_v21 }
 0x321   : > { %v2113_v44 = vpop.f32.mrf.mxu3 }
 0x322   : > { %2249 = vst [vmem:[%s3739_s11 + $0x50] sm:$0xff] %v2233_v12  ;;  %v2236_v45 = vmax.f32 %v2220_v35, 0.0  ;;  %v2181_v28 = vmul.f32 %v3733_v29, %v2113_v44 }
 0x323   : > { %v2144_v39 = vpop.f32.mrf.mxu0 }
 0x324   : > { %2252 = vst [vmem:[%s3739_s11 + $0x68] sm:$0xff] %v2236_v45  ;;  %v2203_v52 = vadd.f32 %v3735_v49, %v2181_v28  ;;  %v2184_v63 = vmul.f32 %v3723_v8, %v2144_v39  ;;  %v2161_v8 = vld [vmem:[%s2972_s12 + $0x70] sm:$0xff] }
 0x326   : > { %v2219_v58 = vadd.f32 %v2203_v52, %v2159_v17  ;;  %v2206_v38 = vadd.f32 %v3725_v59, %v2184_v63 }
 0x328   : > { %v2235_v40 = vmax.f32 %v2219_v58, 0.0  ;;  %v2222_v13 = vadd.f32 %v2206_v38, %v2162_v24 }
 0x329   : > { %v2115_v7 = vpop.f32.mrf.mxu3 }
 0x32a   : > { %2251 = vst [vmem:[%s3739_s11 + $0x60] sm:$0xff] %v2235_v40  ;;  %v2238_v61 = vmax.f32 %v2222_v13, 0.0  ;;  %v2183_v9 = vmul.f32 %v3733_v29, %v2115_v7 }
 0x32c   : > { %2254 = vst [vmem:[%s3739_s11 + $0x78] sm:$0xff] %v2238_v61  ;;  %v2205_v51 = vadd.f32 %v3735_v49, %v2183_v9 }
 0x32e   : > { %v2221_v59 = vadd.f32 %v2205_v51, %v2161_v8 }
 0x330   : > { %v2237_v15 = vmax.f32 %v2221_v59, 0.0 }
 0x332   : > { %2253 = vst [vmem:[%s3739_s11 + $0x70] sm:$0xff] %v2237_v15 }
 0x333   : > { %2802 = shalt.err (!%p2799_p3)
}
 0x334   : > { %s2841_s29 = smov 256   ;;  %s2842_s11 = smov 16  }
 0x335   : > { %2727 = dma.vmem_to_hbm [thread:$0]  (%p2936_p5), %s2269_s25, 2048, %s2271_s17, %s2256_s26, %s2841_s29, %s2841_s29, %s2842_s11  }
 0x336 PF: > { %p2733_p4 = scmp.ge.s32.totalorder %s2837_s16, 2  ;;  %s2285_s12 = sand.u32 1, %s2825_s13  }
 0x337   : > { %s2286_s18 = scalar_lea.sflag [#allocation4], %s2285_s12 }
 0x338   : > { %p2730_p7 = pnand %p2733_p4, %p2940_p6 }
 0x33a   : > { %p2731_p8 = pneg %p2730_p7 }
 0x33c   : > { %2820 = dma.done.wait (%p2731_p8), %s2286_s18, 2048  }
 0x33d   : > { %2822 = vsyncadd (%p2731_p8), %s2286_s18, 4294965248  ;;  %p20_p9 = scmp.ge.s32.totalorder %s2923_s19, 4   ;;  %s3886_s13 = smov %s2829_s14 }
 0x33e   : > { %s3887_s14 = smov %s2833_s15  ;;  %s3888_s15 = smov %s2934_s22 }
 0x33f   : > { %s3889_s16 = smov %s2923_s19  ;;  %22 = sbr.rel (!%p20_p9) target bundleno = 3 (0x3), region = 100 }
 0x344   :  { %2292 = vsyncpa [#allocation4], 1 }
 0x345   :  { %2294 = vsyncpa [#allocation4 + $0x1], 1 }

</bundles_post_ra>
